<compile_context>
chip_gen: v5e
topology: v5e:2x2
jax: 0.10.0
libtpu: 0.0.40
codegen_flags: <defaults>
</compile_context>

<pallas_src>
import functools

import jax
import jax.numpy as jnp
from jax.experimental import pallas as pl
from jax.experimental.pallas import tpu as pltpu


def _pick_tile(dim, pref, align):
    """Largest tile <= pref that is a multiple of `align` and divides `dim`,
    falling back to the full extent (always legal for a BlockSpec)."""
    if dim <= pref:
        return dim
    t = (pref // align) * align
    while t >= align:
        if dim % t == 0:
            return t
        t -= align
    return dim


# ---------------------------------------------------------------------------
# Kernel 1: elementwise fake-quant -> bf16 integer codes (one pass / operand)
# ---------------------------------------------------------------------------
def _prequant_kernel(inv_s_ref, x_ref, q_ref, *, qmin, qmax):
    inv_s = inv_s_ref[0]                              # per-tensor 1/scale (SMEM)
    q = jnp.clip(jnp.round(x_ref[...] * inv_s), qmin, qmax)
    q_ref[...] = q.astype(q_ref.dtype)                # exact: |q| <= 128 in bf16


def _quantize_to_codes(x2d, inv_scale, *, qmin, qmax, tr_pref=256, tc_pref=512):
    R, C = x2d.shape
    tr = _pick_tile(R, tr_pref, 8)
    tc = _pick_tile(C, tc_pref, 128)
    kernel = functools.partial(_prequant_kernel, qmin=qmin, qmax=qmax)
    return pl.pallas_call(
        kernel,
        out_shape=jax.ShapeDtypeStruct((R, C), jnp.bfloat16),
        grid_spec=pl.GridSpec(
            grid=(R // tr, C // tc),
            in_specs=[
                pl.BlockSpec(memory_space=pltpu.MemorySpace.SMEM),   # 1/scale
                pl.BlockSpec((tr, tc), lambda i, j: (i, j)),
            ],
            out_specs=pl.BlockSpec((tr, tc), lambda i, j: (i, j)),
        ),
        compiler_params=pltpu.CompilerParams(
            dimension_semantics=("parallel", "parallel")),
    )(inv_scale, x2d)


# ---------------------------------------------------------------------------
# Kernel 2: tiled batched matmul on the codes, f32 accumulate, rescale once
# ---------------------------------------------------------------------------
def _qmm_kernel(scale_ref, aq_ref, bq_ref, o_ref, acc_ref):
    k = pl.program_id(3)

    @pl.when(k == 0)
    def _():
        acc_ref[...] = jnp.zeros_like(acc_ref)

    acc_ref[...] += jnp.dot(aq_ref[0], bq_ref[0],
                            preferred_element_type=jnp.float32)

    @pl.when(k == pl.num_programs(3) - 1)
    def _():
        # single per-output-tile rescale by s_a * s_b
        o_ref[0] = (acc_ref[...] * scale_ref[0]).astype(o_ref.dtype)


@functools.partial(jax.jit, static_argnames=("bit", "tm", "tn", "tk"))
def quantized_matmul(a, b, bit=8, tm=256, tn=256, tk=512):
    """a: (B, M, K) f32, b: (B, K, N) f32 -> (B, M, N) f32."""
    B, M, K = a.shape
    B2, K2, N = b.shape
    assert B == B2 and K == K2

    qmax = 2.0 ** (bit - 1) - 1.0          # 127
    qmin = -(2.0 ** (bit - 1))             # -128 (PyTorch fake-quant clip range)

    # Deterministic per-tensor symmetric calibration (MinMaxObserver-style).
    # TODO(synk): if `b` were a fixed weight, cache scale_b / codes across calls.
    scale_a = jnp.maximum(jnp.max(jnp.abs(a)), 1e-8) / qmax
    scale_b = jnp.maximum(jnp.max(jnp.abs(b)), 1e-8) / qmax
    inv_sa = jnp.reshape(1.0 / scale_a, (1,)).astype(jnp.float32)
    inv_sb = jnp.reshape(1.0 / scale_b, (1,)).astype(jnp.float32)
    scale_ab = jnp.reshape(scale_a * scale_b, (1,)).astype(jnp.float32)

    # Pre-quantize each operand exactly once (codes are exact in bf16).
    aq = _quantize_to_codes(a.reshape(B * M, K), inv_sa, qmin=qmin, qmax=qmax)
    bq = _quantize_to_codes(b.reshape(B * K, N), inv_sb, qmin=qmin, qmax=qmax)
    aq = aq.reshape(B, M, K)
    bq = bq.reshape(B, K, N)

    # Tile sizes (fall back to full extent when a dim is small / not tileable).
    tm = _pick_tile(M, tm, 8)
    tn = _pick_tile(N, tn, 128)
    tk = _pick_tile(K, tk, 128)
    grid = (B, M // tm, N // tn, K // tk)

    # Double-buffered bf16 input tiles + f32 output tile + f32 accumulator.
    vmem_need = 2 * (tm * tk * 2 + tk * tn * 2 + tm * tn * 4) + tm * tn * 4
    vmem_limit = int(min(max(2 * vmem_need, 16 * 1024 * 1024), 32 * 1024 * 1024))

    cost = pl.CostEstimate(
        flops=2 * B * M * N * K,
        transcendentals=0,
        bytes_accessed=(B * M * K * 2 * (N // tn)
                        + B * K * N * 2 * (M // tm)
                        + B * M * N * 4),
    )

    grid_spec = pltpu.PrefetchScalarGridSpec(
        num_scalar_prefetch=0,
        grid=grid,
        in_specs=[
            pl.BlockSpec(memory_space=pltpu.MemorySpace.SMEM),          # s_a*s_b
            pl.BlockSpec((1, tm, tk), lambda b_, i, j, k: (b_, i, k)),  # a codes
            pl.BlockSpec((1, tk, tn), lambda b_, i, j, k: (b_, k, j)),  # b codes
        ],
        out_specs=pl.BlockSpec((1, tm, tn), lambda b_, i, j, k: (b_, i, j)),
        scratch_shapes=[pltpu.VMEM((tm, tn), jnp.float32)],
    )

    return pl.pallas_call(
        _qmm_kernel,
        out_shape=jax.ShapeDtypeStruct((B, M, N), jnp.float32),
        grid_spec=grid_spec,
        compiler_params=pltpu.CompilerParams(
            dimension_semantics=("parallel", "parallel", "parallel", "arbitrary"),
            vmem_limit_bytes=vmem_limit,
        ),
        cost_estimate=cost,
    )(scale_ab, aq, bq)


def _reference(a, b, bit=8):
    """Pure-JAX reference of the same fake-quant + matmul semantics."""
    qmax = 2.0 ** (bit - 1) - 1.0
    qmin = -(2.0 ** (bit - 1))
    sa = jnp.maximum(jnp.max(jnp.abs(a)), 1e-8) / qmax
    sb = jnp.maximum(jnp.max(jnp.abs(b)), 1e-8) / qmax
    # reciprocal-multiply (same formula as the kernel) — semantically the
    # PyTorch per-tensor symmetric fake-quant with zero_point = 0.
    a_fq = jnp.clip(jnp.round(a * (1.0 / sa)), qmin, qmax) * sa
    b_fq = jnp.clip(jnp.round(b * (1.0 / sb)), qmin, qmax) * sb
    return jnp.einsum("bmk,bkn->bmn", a_fq, b_fq)


if __name__ == "__main__":
    key = jax.random.PRNGKey(0)
    ka, kb = jax.random.split(key)

    B, M, K, N = 2, 16, 512, 256
    a = jax.random.normal(ka, (B, M, K), dtype=jnp.float32)
    b = jax.random.normal(kb, (B, K, N), dtype=jnp.float32)

    ref = _reference(a, b)

    # Config 1: small explicit tiles — exercises K-reduction accumulator
    # (grid k = 4) and N tiling (grid j = 2).
    out_tiled = jax.block_until_ready(quantized_matmul(a, b, tm=16, tn=128, tk=128))
    # Config 2: default tiles — full-extent blocks for these small shapes.
    out_full = jax.block_until_ready(quantized_matmul(a, b))

    for out in (out_tiled, out_full):
        assert out.shape == (B, M, N)
        err = jnp.max(jnp.abs(out - ref))
        assert jnp.allclose(out, ref, atol=2e-3, rtol=2e-3), (
            f"max abs err = {err}"
        )

    print("KERNEL_OK")
</pallas_src>

<mosaic_0001>
module attributes {stable_mosaic.version = 11 : i64} {
  func.func @_prequant_kernel(%arg0: i32, %arg1: i32, %arg2: memref<1xf32, #tpu.memory_space<smem>>, %arg3: memref<256x256xf32, #tpu.memory_space<vmem>>, %arg4: memref<256x256xbf16, #tpu.memory_space<vmem>>) attributes {dimension_semantics = [#tpu.dimension_semantics<parallel>, #tpu.dimension_semantics<parallel>], iteration_bounds = array<i64: 4, 1>, scalar_prefetch = 0 : i64, scratch_operands = 0 : i64, tpu.core_type = #tpu.core_type<tc>, window_params = [{transform_indices = @transform_0, window_bounds = array<i64: 1>}, {transform_indices = @transform_1, window_bounds = array<i64: 256, 256>}, {transform_indices = @transform_2, window_bounds = array<i64: 256, 256>}]} {
    %c0 = arith.constant 0 : index
    %0 = memref.load %arg2[%c0] : memref<1xf32, #tpu.memory_space<smem>>
    %c0_0 = arith.constant 0 : index
    %c0_1 = arith.constant 0 : index
    %1 = vector.load %arg3[%c0_0, %c0_1] : memref<256x256xf32, #tpu.memory_space<vmem>>, vector<256x256xf32>
    %2 = vector.broadcast %0 : f32 to vector<256x256xf32>
    %3 = arith.mulf %1, %2 : vector<256x256xf32>
    %4 = math.roundeven %3 : vector<256x256xf32>
    %cst = arith.constant -1.280000e+02 : f32
    %cst_2 = arith.constant 1.270000e+02 : f32
    %5 = vector.broadcast %cst : f32 to vector<256x256xf32>
    %6 = arith.maximumf %5, %4 : vector<256x256xf32>
    %7 = vector.broadcast %cst_2 : f32 to vector<256x256xf32>
    %8 = arith.minimumf %7, %6 : vector<256x256xf32>
    %9 = arith.truncf %8 : vector<256x256xf32> to vector<256x256xbf16>
    %c0_3 = arith.constant 0 : index
    %c0_4 = arith.constant 0 : index
    %10 = vector.load %arg4[%c0_3, %c0_4] : memref<256x256xbf16, #tpu.memory_space<vmem>>, vector<256x256xbf16>
    tpu.vector_store %arg4[%c0_3, %c0_4], %9 {strides = array<i32>} : memref<256x256xbf16, #tpu.memory_space<vmem>>, vector<256x256xbf16>,
    return
  }
  func.func @transform_0(%arg0: i32, %arg1: i32) -> i32 {
    %c0_i32 = arith.constant 0 : i32
    %c0_i32_0 = arith.constant 0 : i32
    return %c0_i32 : i32
  }
  func.func @transform_1(%arg0: i32, %arg1: i32) -> (i32, i32) {
    %c0_i32 = arith.constant 0 : i32
    return %arg0, %arg1 : i32, i32
  }
  func.func @transform_2(%arg0: i32, %arg1: i32) -> (i32, i32) {
    %c0_i32 = arith.constant 0 : i32
    return %arg0, %arg1 : i32, i32
  }
}

module attributes {stable_mosaic.version = 11 : i64} {
  func.func @_prequant_kernel(%arg0: i32, %arg1: i32, %arg2: memref<1xf32, #tpu.memory_space<smem>>, %arg3: memref<32x512xf32, #tpu.memory_space<vmem>>, %arg4: memref<32x512xbf16, #tpu.memory_space<vmem>>) attributes {dimension_semantics = [#tpu.dimension_semantics<parallel>, #tpu.dimension_semantics<parallel>], iteration_bounds = array<i64: 1, 1>, scalar_prefetch = 0 : i64, scratch_operands = 0 : i64, tpu.core_type = #tpu.core_type<tc>, window_params = [{transform_indices = @transform_0, window_bounds = array<i64: 1>}, {transform_indices = @transform_1, window_bounds = array<i64: 32, 512>}, {transform_indices = @transform_2, window_bounds = array<i64: 32, 512>}]} {
    %c0 = arith.constant 0 : index
    %0 = memref.load %arg2[%c0] : memref<1xf32, #tpu.memory_space<smem>>
    %c0_0 = arith.constant 0 : index
    %c0_1 = arith.constant 0 : index
    %1 = vector.load %arg3[%c0_0, %c0_1] : memref<32x512xf32, #tpu.memory_space<vmem>>, vector<32x512xf32>
    %2 = vector.broadcast %0 : f32 to vector<32x512xf32>
    %3 = arith.mulf %1, %2 : vector<32x512xf32>
    %4 = math.roundeven %3 : vector<32x512xf32>
    %cst = arith.constant -1.280000e+02 : f32
    %cst_2 = arith.constant 1.270000e+02 : f32
    %5 = vector.broadcast %cst : f32 to vector<32x512xf32>
    %6 = arith.maximumf %5, %4 : vector<32x512xf32>
    %7 = vector.broadcast %cst_2 : f32 to vector<32x512xf32>
    %8 = arith.minimumf %7, %6 : vector<32x512xf32>
    %9 = arith.truncf %8 : vector<32x512xf32> to vector<32x512xbf16>
    %c0_3 = arith.constant 0 : index
    %c0_4 = arith.constant 0 : index
    %10 = vector.load %arg4[%c0_3, %c0_4] : memref<32x512xbf16, #tpu.memory_space<vmem>>, vector<32x512xbf16>
    tpu.vector_store %arg4[%c0_3, %c0_4], %9 {strides = array<i32>} : memref<32x512xbf16, #tpu.memory_space<vmem>>, vector<32x512xbf16>,
    return
  }
  func.func @transform_0(%arg0: i32, %arg1: i32) -> i32 {
    %c0_i32 = arith.constant 0 : i32
    %c0_i32_0 = arith.constant 0 : i32
    return %c0_i32 : i32
  }
  func.func @transform_1(%arg0: i32, %arg1: i32) -> (i32, i32) {
    %c0_i32 = arith.constant 0 : i32
    return %arg0, %arg1 : i32, i32
  }
  func.func @transform_2(%arg0: i32, %arg1: i32) -> (i32, i32) {
    %c0_i32 = arith.constant 0 : i32
    return %arg0, %arg1 : i32, i32
  }
}

module attributes {stable_mosaic.version = 11 : i64} {
  func.func @_qmm_kernel(%arg0: i32, %arg1: i32, %arg2: i32, %arg3: i32, %arg4: memref<1xf32, #tpu.memory_space<smem>>, %arg5: memref<1x16x128xbf16, #tpu.memory_space<vmem>>, %arg6: memref<1x128x128xbf16, #tpu.memory_space<vmem>>, %arg7: memref<1x16x128xf32, #tpu.memory_space<vmem>>, %arg8: memref<16x128xf32, #tpu.memory_space<vmem>>) attributes {dimension_semantics = [#tpu.dimension_semantics<parallel>, #tpu.dimension_semantics<parallel>, #tpu.dimension_semantics<parallel>, #tpu.dimension_semantics<arbitrary>], iteration_bounds = array<i64: 2, 1, 2, 4>, scalar_prefetch = 0 : i64, scratch_operands = 1 : i64, tpu.core_type = #tpu.core_type<tc>, window_params = [{transform_indices = @transform_0, window_bounds = array<i64: 1>}, {transform_indices = @transform_1, window_bounds = array<i64: 1, 16, 128>}, {transform_indices = @transform_2, window_bounds = array<i64: 1, 128, 128>}, {transform_indices = @transform_3, window_bounds = array<i64: 1, 16, 128>}]} {
    %c0_i32 = arith.constant 0 : i32
    %0 = arith.cmpi eq, %arg3, %c0_i32 : i32
    %1 = arith.extui %0 : i1 to i32
    %c0_i32_0 = arith.constant 0 : i32
    %2 = arith.cmpi ne, %1, %c0_i32_0 : i32
    scf.if %2 {
      %cst_11 = arith.constant 0.000000e+00 : f32
      %14 = vector.broadcast %cst_11 : f32 to vector<16x128xf32>
      %c0_12 = arith.constant 0 : index
      %c0_13 = arith.constant 0 : index
      %15 = vector.load %arg8[%c0_12, %c0_13] : memref<16x128xf32, #tpu.memory_space<vmem>>, vector<16x128xf32>
      tpu.vector_store %arg8[%c0_12, %c0_13], %14 {strides = array<i32>} : memref<16x128xf32, #tpu.memory_space<vmem>>, vector<16x128xf32>,
    } else {
    }
    %c0 = arith.constant 0 : index
    %c0_1 = arith.constant 0 : index
    %3 = vector.load %arg8[%c0, %c0_1] : memref<16x128xf32, #tpu.memory_space<vmem>>, vector<16x128xf32>
    %c0_2 = arith.constant 0 : index
    %c0_3 = arith.constant 0 : index
    %c0_4 = arith.constant 0 : index
    %4 = vector.load %arg5[%c0_2, %c0_3, %c0_4] : memref<1x16x128xbf16, #tpu.memory_space<vmem>>, vector<1x16x128xbf16>
    %5 = vector.shape_cast %4 : vector<1x16x128xbf16> to vector<16x128xbf16>
    %c0_5 = arith.constant 0 : index
    %c0_6 = arith.constant 0 : index
    %c0_7 = arith.constant 0 : index
    %6 = vector.load %arg6[%c0_5, %c0_6, %c0_7] : memref<1x128x128xbf16, #tpu.memory_space<vmem>>, vector<1x128x128xbf16>
    %7 = vector.shape_cast %6 : vector<1x128x128xbf16> to vector<128x128xbf16>
    %cst = arith.constant dense<0.000000e+00> : vector<16x128xf32>
    %8 = tpu.matmul %5, %7, %cst {dimension_numbers = #tpu.dot_dimension_numbers<[1], [0], [0], [1], [0, 0, 1, 1], [], []>} : vector<16x128xbf16>, vector<128x128xbf16>, vector<16x128xf32> -> vector<16x128xf32>
    %9 = arith.addf %3, %8 : vector<16x128xf32>
    %c0_8 = arith.constant 0 : index
    %c0_9 = arith.constant 0 : index
    %10 = vector.load %arg8[%c0_8, %c0_9] : memref<16x128xf32, #tpu.memory_space<vmem>>, vector<16x128xf32>
    tpu.vector_store %arg8[%c0_8, %c0_9], %9 {strides = array<i32>} : memref<16x128xf32, #tpu.memory_space<vmem>>, vector<16x128xf32>,
    %c3_i32 = arith.constant 3 : i32
    %11 = arith.cmpi eq, %arg3, %c3_i32 : i32
    %12 = arith.extui %11 : i1 to i32
    %c0_i32_10 = arith.constant 0 : i32
    %13 = arith.cmpi ne, %12, %c0_i32_10 : i32
    scf.if %13 {
      %c0_11 = arith.constant 0 : index
      %c0_12 = arith.constant 0 : index
      %14 = vector.load %arg8[%c0_11, %c0_12] : memref<16x128xf32, #tpu.memory_space<vmem>>, vector<16x128xf32>
      %c0_13 = arith.constant 0 : index
      %15 = memref.load %arg4[%c0_13] : memref<1xf32, #tpu.memory_space<smem>>
      %16 = vector.broadcast %15 : f32 to vector<16x128xf32>
      %17 = arith.mulf %14, %16 : vector<16x128xf32>
      %c0_14 = arith.constant 0 : index
      %c0_15 = arith.constant 0 : index
      %c0_16 = arith.constant 0 : index
      %18 = vector.load %arg7[%c0_14, %c0_15, %c0_16] : memref<1x16x128xf32, #tpu.memory_space<vmem>>, vector<1x16x128xf32>
      %19 = vector.shape_cast %18 : vector<1x16x128xf32> to vector<16x128xf32>
      %20 = vector.shape_cast %17 : vector<16x128xf32> to vector<1x16x128xf32>
      tpu.vector_store %arg7[%c0_14, %c0_15, %c0_16], %20 {strides = array<i32>} : memref<1x16x128xf32, #tpu.memory_space<vmem>>, vector<1x16x128xf32>,
    } else {
    }
    return
  }
  func.func @transform_0(%arg0: i32, %arg1: i32, %arg2: i32, %arg3: i32) -> i32 {
    %c0_i32 = arith.constant 0 : i32
    %c0_i32_0 = arith.constant 0 : i32
    return %c0_i32 : i32
  }
  func.func @transform_1(%arg0: i32, %arg1: i32, %arg2: i32, %arg3: i32) -> (i32, i32, i32) {
    %c0_i32 = arith.constant 0 : i32
    return %arg0, %arg1, %arg3 : i32, i32, i32
  }
  func.func @transform_2(%arg0: i32, %arg1: i32, %arg2: i32, %arg3: i32) -> (i32, i32, i32) {
    %c0_i32 = arith.constant 0 : i32
    return %arg0, %arg3, %arg2 : i32, i32, i32
  }
  func.func @transform_3(%arg0: i32, %arg1: i32, %arg2: i32, %arg3: i32) -> (i32, i32, i32) {
    %c0_i32 = arith.constant 0 : i32
    return %arg0, %arg1, %arg2 : i32, i32, i32
  }
}

</mosaic_0001>

<bundles_post_ra>
// kernel: quantized_matmul.3
= control target key start
LH: loop header
LB: loop body
LE: loop exit
PB: predicated region body
PF: predicated region fallthrough
CT: control target
= control target key end

     0   :  { %s434_s0 = inlined_call_operand.<no memory space> [shape: f32[1], index: 0, kind: input, shape index: {}]   ;;  %s435_s1 = inlined_call_operand.vmem [shape: f32[32,512], index: 1, kind: input, shape index: {}]   ;;  %s436_s2 = inlined_call_operand.vmem [shape: bf16[32,512], index: 2, kind: output, shape index: {}]  }
   0x1   :  { %v13_v0 = vld [vmem:[%s435_s1] sm:$0xff]  ;;  %v14_v1 = vld [vmem:[%s435_s1 + $0x8] sm:$0xff]  ;;  %v266_v2 = vstv %s434_s0  ;;  %v15_v3 = vld [vmem:[%s435_s1 + $0x10] sm:$0xff] }
   0x2   :  { %v30_v4 = vmul.f32 %v266_v2, %v13_v0  ;;  %v31_v5 = vmul.f32 %v266_v2, %v14_v1  ;;  %v16_v6 = vld [vmem:[%s435_s1 + $0x18] sm:$0xff]  ;;  %v32_v7 = vmul.f32 %v266_v2, %v15_v3  ;;  %v17_v8 = vld [vmem:[%s435_s1 + $0x20] sm:$0xff]  ;;  %v18_v9 = vld [vmem:[%s435_s1 + $0x28] sm:$0xff] }
   0x3   :  { %v33_v10 = vmul.f32 %v266_v2, %v16_v6  ;;  %v34_v11 = vmul.f32 %v266_v2, %v17_v8  ;;  %v286_v15 = vmul.f32 %v266_v2, %v18_v9  ;;  %v19_v48 = vld [vmem:[%s435_s1 + $0x30] sm:$0xff]  ;;  %v20_v53 = vld [vmem:[%s435_s1 + $0x38] sm:$0xff] }
   0x4   :  { %v114_v12 = vand.u32 2147483647, %v30_v4  ;;  %v116_v13 = vcvt.f32.s32 %v30_v4  ;;  %v122_v14 = vand.u32 2147483647, %v31_v5  ;;  %v119_v16 = vand.u32 2147483648, %v30_v4  ;;  %v23_v22 = vld [vmem:[%s435_s1 + $0x50] sm:$0xff] }
   0x5   :  { %v124_v17 = vcvt.f32.s32 %v31_v5  ;;  %v130_v18 = vand.u32 2147483647, %v32_v7  ;;  %v132_v19 = vcvt.f32.s32 %v32_v7  ;;  %v127_v23 = vand.u32 2147483648, %v31_v5 }
   0x6   :  { %vm288_vm0 = vcmp.lt.f32.partialorder %v114_v12, 8388608.0  ;;  %v117_v21 = vcvt.s32.f32 %v116_v13  ;;  %vm292_vm1 = vcmp.lt.f32.partialorder %v122_v14, 8388608.0  ;;  %v135_v26 = vand.u32 2147483648, %v32_v7 }
   0x7   :  { %v125_v24 = vcvt.s32.f32 %v124_v17  ;;  %v133_v25 = vcvt.s32.f32 %v132_v19  ;;  %v138_v27 = vand.u32 2147483647, %v33_v10  ;;  %vm296_vm2 = vcmp.lt.f32.partialorder %v130_v18, 8388608.0 }
   0x8   :  { %v118_v28 = vand.u32 2147483647, %v117_v21  ;;  %v140_v30 = vcvt.f32.s32 %v33_v10  ;;  %v146_v31 = vand.u32 2147483647, %v34_v11  ;;  %v143_v34 = vand.u32 2147483648, %v33_v10 }
   0x9   :  { %v126_v32 = vand.u32 2147483647, %v125_v24  ;;  %v134_v33 = vand.u32 2147483647, %v133_v25  ;;  %v148_v35 = vcvt.f32.s32 %v34_v11  ;;  %vm300_vm3 = vcmp.lt.f32.partialorder %v138_v27, 8388608.0 }
   0xa   :  { %v120_v36 = vor.u32 %v119_v16, %v118_v28  ;;  %v141_v38 = vcvt.s32.f32 %v140_v30  ;;  %vm304_vm4 = vcmp.lt.f32.partialorder %v146_v31, 8388608.0  ;;  %v151_v43 = vand.u32 2147483648, %v34_v11  ;;  %v28_v31 = vld [vmem:[%s435_s1 + $0x78] sm:$0xff] }
   0xb   :  { %v128_v40 = vor.u32 %v127_v23, %v126_v32  ;;  %v136_v41 = vor.u32 %v135_v26, %v134_v33  ;;  %v149_v42 = vcvt.s32.f32 %v148_v35  ;;  %v154_v46 = vand.u32 2147483647, %v286_v15 }
   0xc   :  { %v121_v44 = vsel %vm288_vm0, %v120_v36, %v30_v4  ;;  %v142_v45 = vand.u32 2147483647, %v141_v38  ;;  %v156_v47 = vcvt.f32.s32 %v286_v15  ;;  %v159_v57 = vand.u32 2147483648, %v286_v15  ;;  %v24_v38 = vld [vmem:[%s435_s1 + $0x58] sm:$0xff] }
   0xd   :  { %v129_v49 = vsel %vm292_vm1, %v128_v40, %v31_v5  ;;  %v62_v50 = vmax.f32 %v121_v44, -128.0  ;;  %v137_v51 = vsel %vm296_vm2, %v136_v41, %v32_v7  ;;  %v150_v52 = vand.u32 2147483647, %v149_v42 }
   0xe   :  { %v63_v54 = vmax.f32 %v129_v49, -128.0  ;;  %v144_v55 = vor.u32 %v143_v34, %v142_v45  ;;  %v64_v56 = vmax.f32 %v137_v51, -128.0  ;;  %v157_v60 = vcvt.s32.f32 %v156_v47 }
   0xf   :  { %v78_v58 = vmin.f32 %v62_v50, 127.0  ;;  %v152_v59 = vor.u32 %v151_v43, %v150_v52  ;;  %v36_v61 = vmul.f32 %v266_v2, %v19_v48  ;;  %v37_v1 = vmul.f32 %v266_v2, %v20_v53 }
  0x10   :  { %v79_v62 = vmin.f32 %v63_v54, 127.0  ;;  %v145_v63 = vsel %vm300_vm3, %v144_v55, %v33_v10  ;;  %v80_v0 = vmin.f32 %v64_v56, 127.0  ;;  %v158_v5 = vand.u32 2147483647, %v157_v60  ;;  %v21_v10 = vld [vmem:[%s435_s1 + $0x40] sm:$0xff] }
  0x11   :  { %v65_v3 = vmax.f32 %v145_v63, -128.0  ;;  %v153_v4 = vsel %vm304_vm4, %v152_v59, %v34_v11  ;;  %v162_v6 = vand.u32 2147483647, %v36_v61  ;;  %vm329_vm5 = vcmp.lt.f32.partialorder %v154_v46, 8388608.0  ;;  %v22_v11 = vld [vmem:[%s435_s1 + $0x48] sm:$0xff]  ;;  %v25_v63 = vld [vmem:[%s435_s1 + $0x60] sm:$0xff] }
  0x12   :  { %v94_v7 = vpack.c.bf16 %v79_v62, %v78_v58  ;;  %v66_v9 = vmax.f32 %v153_v4, -128.0  ;;  %v164_v12 = vcvt.f32.s32 %v36_v61  ;;  %v160_v14 = vor.u32 %v159_v57, %v158_v5 }
  0x13   :  { %v81_v13 = vmin.f32 %v65_v3, 127.0  ;;  %v167_v16 = vand.u32 2147483648, %v36_v61  ;;  %v170_v17 = vand.u32 2147483647, %v37_v1  ;;  %vm342_vm6 = vcmp.lt.f32.partialorder %v162_v6, 8388608.0 }
  0x14   :  { %102 = vst [vmem:[%s436_s2] sm:$0xff] %v94_v7  ;;  %v82_v18 = vmin.f32 %v66_v9, 127.0  ;;  %v165_v20 = vcvt.s32.f32 %v164_v12  ;;  %v172_v21 = vcvt.f32.s32 %v37_v1  ;;  %v161_v24 = vsel %vm329_vm5, %v160_v14, %v286_v15 }
  0x15   :  { %v95_v23 = vpack.c.bf16 %v81_v13, %v80_v0  ;;  %v175_v25 = vand.u32 2147483648, %v37_v1  ;;  %v38_v26 = vmul.f32 %v266_v2, %v21_v10  ;;  %v67_v27 = vmax.f32 %v161_v24, -128.0  ;;  %v26_v0 = vld [vmem:[%s435_s1 + $0x68] sm:$0xff] }
  0x16   :  { %v166_v28 = vand.u32 2147483647, %v165_v20  ;;  %v173_v29 = vcvt.s32.f32 %v172_v21  ;;  %v39_v30 = vmul.f32 %v266_v2, %v22_v11  ;;  %vm357_vm7 = vcmp.lt.f32.partialorder %v170_v17, 8388608.0 }
  0x17   :  { %103 = vst [vmem:[%s436_s2 + $0x8] sm:$0xff] %v95_v23  ;;  %v178_v32 = vand.u32 2147483647, %v38_v26  ;;  %v180_v33 = vcvt.f32.s32 %v38_v26  ;;  %v40_v15 = vmul.f32 %v266_v2, %v23_v22  ;;  %v83_v34 = vmin.f32 %v67_v27, 127.0 }
  0x18   :  { %v168_v35 = vor.u32 %v167_v16, %v166_v28  ;;  %v174_v36 = vand.u32 2147483647, %v173_v29  ;;  %v186_v37 = vand.u32 2147483647, %v39_v30  ;;  %v183_v41 = vand.u32 2147483648, %v38_v26 }
  0x19   :  { %vm365_vm8 = vcmp.lt.f32.partialorder %v178_v32, 8388608.0  ;;  %v181_v40 = vcvt.s32.f32 %v180_v33  ;;  %v188_v42 = vcvt.f32.s32 %v39_v30  ;;  %v96_v43 = vpack.c.bf16 %v83_v34, %v82_v18 }
  0x1a   :  { %v169_v44 = vsel %vm342_vm6, %v168_v35, %v36_v61  ;;  %v176_v45 = vor.u32 %v175_v25, %v174_v36  ;;  %v191_v46 = vand.u32 2147483648, %v39_v30  ;;  %v41_v50 = vmul.f32 %v266_v2, %v24_v38 }
  0x1b   :  { %v68_v47 = vmax.f32 %v169_v44, -128.0  ;;  %v182_v48 = vand.u32 2147483647, %v181_v40  ;;  %v189_v49 = vcvt.s32.f32 %v188_v42  ;;  %104 = vst [vmem:[%s436_s2 + $0x10] sm:$0xff] %v96_v43  ;;  %vm377_vm9 = vcmp.lt.f32.partialorder %v186_v37, 8388608.0 }
  0x1c   :  { %v177_v51 = vsel %vm357_vm7, %v176_v45, %v37_v1  ;;  %v194_v53 = vand.u32 2147483647, %v40_v15  ;;  %v196_v54 = vcvt.f32.s32 %v40_v15  ;;  %v199_v61 = vand.u32 2147483648, %v40_v15 }
  0x1d   :  { %v69_v55 = vmax.f32 %v177_v51, -128.0  ;;  %v84_v56 = vmin.f32 %v68_v47, 127.0  ;;  %v184_v57 = vor.u32 %v183_v41, %v182_v48  ;;  %v190_v58 = vand.u32 2147483647, %v189_v49 }
  0x1e   :  { %vm381_vm10 = vcmp.lt.f32.partialorder %v194_v53, 8388608.0  ;;  %v197_v60 = vcvt.s32.f32 %v196_v54  ;;  %v204_v62 = vcvt.f32.s32 %v41_v50  ;;  %v202_v5 = vand.u32 2147483647, %v41_v50 }
  0x1f   :  { %v85_v1 = vmin.f32 %v69_v55, 127.0  ;;  %v185_v3 = vsel %vm365_vm8, %v184_v57, %v38_v26  ;;  %v192_v4 = vor.u32 %v191_v46, %v190_v58  ;;  %v207_v9 = vand.u32 2147483648, %v41_v50  ;;  %v27_v26 = vld [vmem:[%s435_s1 + $0x70] sm:$0xff] }
  0x20   :  { %v70_v6 = vmax.f32 %v185_v3, -128.0  ;;  %v198_v7 = vand.u32 2147483647, %v197_v60  ;;  %v205_v8 = vcvt.s32.f32 %v204_v62  ;;  %v42_v13 = vmul.f32 %v266_v2, %v25_v63 }
  0x21   :  { %v97_v12 = vpack.c.bf16 %v85_v1, %v84_v56  ;;  %v193_v10 = vsel %vm377_vm9, %v192_v4, %v39_v30  ;;  %v43_v14 = vmul.f32 %v266_v2, %v26_v0  ;;  %vm400_vm11 = vcmp.lt.f32.partialorder %v202_v5, 8388608.0 }
  0x22   :  { %v71_v16 = vmax.f32 %v193_v10, -128.0  ;;  %v86_v17 = vmin.f32 %v70_v6, 127.0  ;;  %v200_v11 = vor.u32 %v199_v61, %v198_v7  ;;  %v206_v18 = vand.u32 2147483647, %v205_v8 }
  0x23   :  { %105 = vst [vmem:[%s436_s2 + $0x18] sm:$0xff] %v97_v12  ;;  %v210_v20 = vand.u32 2147483647, %v42_v13  ;;  %v212_v21 = vcvt.f32.s32 %v42_v13  ;;  %v220_v25 = vcvt.f32.s32 %v43_v14  ;;  %v215_v29 = vand.u32 2147483648, %v42_v13 }
  0x24   :  { %v87_v22 = vmin.f32 %v71_v16, 127.0  ;;  %v201_v23 = vsel %vm381_vm10, %v200_v11, %v40_v15  ;;  %v208_v24 = vor.u32 %v207_v9, %v206_v18  ;;  %v218_v30 = vand.u32 2147483647, %v43_v14 }
  0x25   :  { %v72_v27 = vmax.f32 %v201_v23, -128.0  ;;  %v213_v28 = vcvt.s32.f32 %v212_v21  ;;  %v221_v34 = vcvt.s32.f32 %v220_v25  ;;  %v223_v15 = vand.u32 2147483648, %v43_v14 }
  0x26   :  { %v98_v32 = vpack.c.bf16 %v87_v22, %v86_v17  ;;  %v209_v33 = vsel %vm400_vm11, %v208_v24, %v41_v50  ;;  %v44_v38 = vmul.f32 %v266_v2, %v27_v26  ;;  %vm418_vm12 = vcmp.lt.f32.partialorder %v210_v20, 8388608.0 }
  0x27   :  { %v73_v35 = vmax.f32 %v209_v33, -128.0  ;;  %v88_v36 = vmin.f32 %v72_v27, 127.0  ;;  %v214_v37 = vand.u32 2147483647, %v213_v28  ;;  %v222_v40 = vand.u32 2147483647, %v221_v34 }
  0x28   :  { %106 = vst [vmem:[%s436_s2 + $0x20] sm:$0xff] %v98_v32  ;;  %v45_v41 = vmul.f32 %v266_v2, %v28_v31  ;;  %vm219_vm13 = vcmp.lt.f32.partialorder %v218_v30, 8388608.0  ;;  %v228_v44 = vcvt.f32.s32 %v44_v38  ;;  %v226_v46 = vand.u32 2147483647, %v44_v38 }
  0x29   :  { %v89_v42 = vmin.f32 %v73_v35, 127.0  ;;  %v216_v43 = vor.u32 %v215_v29, %v214_v37  ;;  %v224_v45 = vor.u32 %v223_v15, %v222_v40  ;;  %v231_v47 = vand.u32 2147483648, %v44_v38 }
  0x2a   :  { %v236_v48 = vcvt.f32.s32 %v45_v41  ;;  %v229_v51 = vcvt.s32.f32 %v228_v44  ;;  %v234_v52 = vand.u32 2147483647, %v45_v41  ;;  %v239_v57 = vand.u32 2147483648, %v45_v41 }
  0x2b   :  { %v99_v49 = vpack.c.bf16 %v89_v42, %v88_v36  ;;  %v217_v50 = vsel %vm418_vm12, %v216_v43, %v42_v13  ;;  %v225_v53 = vsel %vm219_vm13, %v224_v45, %v43_v14  ;;  %vm227_vm14 = vcmp.lt.f32.partialorder %v226_v46, 8388608.0 }
  0x2c   :  { %v74_v54 = vmax.f32 %v217_v50, -128.0  ;;  %v237_v55 = vcvt.s32.f32 %v236_v48  ;;  %v75_v2 = vmax.f32 %v225_v53, -128.0  ;;  %v230_v56 = vand.u32 2147483647, %v229_v51 }
  0x2d   :  { %107 = vst [vmem:[%s436_s2 + $0x28] sm:$0xff] %v99_v49  ;;  %vm235_vm15 = vcmp.lt.f32.partialorder %v234_v52, 8388608.0 }
  0x2e   :  { %v90_v58 = vmin.f32 %v74_v54, 127.0  ;;  %v238_v59 = vand.u32 2147483647, %v237_v55  ;;  %v91_v60 = vmin.f32 %v75_v2, 127.0  ;;  %v232_v61 = vor.u32 %v231_v47, %v230_v56 }
  0x30   :  { %v240_v62 = vor.u32 %v239_v57, %v238_v59  ;;  %v100_v63 = vpack.c.bf16 %v91_v60, %v90_v58  ;;  %v233_v0 = vsel %vm227_vm14, %v232_v61, %v44_v38 }
  0x31   :  { %v76_v3 = vmax.f32 %v233_v0, -128.0 }
  0x32   :  { %v241_v1 = vsel %vm235_vm15, %v240_v62, %v45_v41  ;;  %108 = vst [vmem:[%s436_s2 + $0x30] sm:$0xff] %v100_v63 }
  0x33   :  { %v77_v4 = vmax.f32 %v241_v1, -128.0  ;;  %v92_v5 = vmin.f32 %v76_v3, 127.0 }
  0x35   :  { %v93_v6 = vmin.f32 %v77_v4, 127.0 }
  0x37   :  { %v101_v7 = vpack.c.bf16 %v93_v6, %v92_v5 }
  0x39   :  { %109 = vst [vmem:[%s436_s2 + $0x38] sm:$0xff] %v101_v7 }

// kernel: quantized_matmul.5
= control target key start
LH: loop header
LB: loop body
LE: loop exit
PB: predicated region body
PF: predicated region fallthrough
CT: control target
= control target key end

     0   :  { %s1249_s0 = inlined_call_operand.<no memory space> [shape: f32[1], index: 0, kind: input, shape index: {}]   ;;  %s1250_s1 = inlined_call_operand.vmem [shape: bf16[2,16,512], index: 1, kind: input, shape index: {}]   ;;  %s1251_s2 = inlined_call_operand.vmem [shape: bf16[2,512,256], index: 2, kind: input, shape index: {}]   ;;  %s1252_s3 = inlined_call_operand.hbm [shape: f32[2,16,256], index: 3, kind: output, shape index: {}]  }
   0x1   :  { %1256 = sst [smem:[#allocation14_spill]] %s1250_s1 }
   0x2   :  { %1257 = sst [smem:[#allocation15_spill]] %s1251_s2 }
   0x3   :  { %1258 = sst [smem:[#allocation16_spill]] %s1252_s3 }
   0x4   :  { %8 = sst [smem:[#allocation3]] %s1249_s0 }
   0x5   :  { %9 = vsyncpa [#allocation7], 0 }
   0x6   :  { %11 = vsyncpa [#allocation7 + $0x1], 0  ;;  %s1002_s14 = smov 0   ;;  %s1004_s15 = smov 0  }
   0x7   :  { %s1006_s16 = smov 0   ;;  %s1008_s17 = smov 0  }
   0x8   :  { %s1010_s18 = smov 0   ;;  %s1012_s19 = smov 0  }
   0x9   :  { %s1014_s20 = smov 0   ;;  %s1016_s21 = smov 0  }
   0xa   :  { %s1018_s22 = smov 0   ;;  %s1020_s0 = smov 0  }
   0xb   :  { %s1022_s23 = smov 0   ;;  %s1024_s24 = smov 0  }
   0xc   :  { %s1026_s25 = smov 0   ;;  %s1028_s26 = smov 0  }
   0xd LB: > { %1259 = sst [smem:[#allocation9_spill]] %s949_s21  ;;  %s639_s27 = sadd.s32 4294967295, %s973_s26   ;;  %s973_s26 = sphi %s1028_s26, %s17_s26   ;;  %s969_s25 = sphi %s1026_s25, %s1291_s25   ;;  %s965_s24 = sphi %s1024_s24, %s1290_s24   ;;  %s961_s23 = sphi %s1022_s23, %s1289_s23   ;;  %s957_s0 = sphi %s1020_s0, %s1288_s0   ;;  %s953_s22 = sphi %s1018_s22, %s1287_s22   ;;  %s949_s21 = sphi %s1016_s21, %s1286_s21   ;;  %s945_s20 = sphi %s1014_s20, %s1285_s20   ;;  %s941_s19 = sphi %s1012_s19, %s1284_s19   ;;  %s937_s18 = sphi %s1010_s18, %s1283_s18   ;;  %s933_s17 = sphi %s1008_s17, %s1282_s17   ;;  %s929_s16 = sphi %s1006_s16, %s1281_s16   ;;  %s925_s15 = sphi %s1004_s15, %s1280_s15   ;;  %s921_s14 = sphi %s1002_s14, %s1279_s14  }
   0xe   : > { %1260 = sst [smem:[#allocation10_spill]] %s953_s22  ;;  %s640_s28 = sadd.s32 4294967294, %s973_s26  }
   0xf   : > { %1261 = sst [smem:[#allocation11_spill]] %s957_s0  ;;  %s32_s29 = sadd.s32 1, %s961_s23 }
  0x10   : > { %s35_s30 = sadd.s32 1, %s965_s24  ;;  %p33_p0 = scmp.ge.s32.totalorder %s32_s29, 4 }
  0x11   : > { %s43_s4 = sadd.s32 1, %s969_s25  ;;  %p82_p1 = scmp.ne.s32.totalorder %s945_s20, %s941_s19 }
  0x12   : > { %s1293_s29 = smov (%p33_p0, %s32_s29), 0  ;;  %s1295_s30 = smov (!%p33_p0, %s35_s30), %s965_s24 }
  0x13   : > { %1262 = sst [smem:[#allocation12_spill]] %s1293_s29  ;;  %s71_s6 = ssub.s32 %s961_s23, %s1293_s29 }
  0x14   : > { %p83_p2 = scmp.eq.s32.totalorder %s973_s26, 0  ;;  %p37_p3 = scmp.ge.s32.totalorder %s1295_s30, 2 }
  0x15   : > { %s105_s7 = sadd.s32 1, %s937_s18  ;;  %p112_p5 = scmp.ne.s32.totalorder %s937_s18, %s933_s17 }
  0x16   : > { %p1087_p4 = por %p83_p2, %p82_p1  ;;  %s1297_s30 = smov (%p37_p3, %s1295_s30), 0 }
  0x17   : > { %1264 = sst [smem:[#allocation13_spill]] %s1297_s30  ;;  %s1299_s4 = smov (!%p37_p3, %s43_s4), %s969_s25 }
  0x18   : > { %s101_s9 = ssub.s32 %s965_s24, %s1297_s30  ;;  %p1098_p6 = por %p112_p5, %p83_p2 }
  0x19   : > { %p45_p7 = scmp.ge.s32.totalorder %s1299_s4, 2  ;;  %s135_s11 = sadd.s32 1, %s929_s16 }
  0x1a   : > { %p145_p8 = scmp.ne.s32.totalorder %s929_s16, %s925_s15  ;;  %p146_p9 = scmp.eq.s32.totalorder %s639_s27, 15 }
  0x1b   : > { %s1301_s4 = smov (%p45_p7, %s1299_s4), 0  ;;  %p151_p11 = scmp.ne.s32.totalorder %s925_s15, %s921_s14 }
  0x1c   : > { %p1107_p10 = por %p146_p9, %p145_p8  ;;  %s68_s13 = ssub.s32 %s969_s25, %s1301_s4 }
  0x1d   : > { %p152_p12 = scmp.eq.s32.totalorder %s640_s28, 15  ;;  %s72_s5 = sor.u32 %s71_s6, %s68_s13 }
  0x1e   : > { %s132_s30 = sor.u32 %s101_s9, %s68_s13  ;;  %p73_p13 = scmp.eq.s32.totalorder %s72_s5, 0 }
  0x1f   : > { %s102_s29 = sor.u32 %s101_s9, %s72_s5  ;;  %p133_p1 = scmp.eq.s32.totalorder %s132_s30, 0 }
  0x20   : > { %p103_p0 = scmp.eq.s32.totalorder %s102_s29, 0  ;;  %s1267_s3 = sadd.s32 1, %s945_s20 }
  0x21   : > { %s1118_s22 = scalar_select %p73_p13, %s945_s20, %s1267_s3  }
  0x22   : > { %s1121_s27 = scalar_select %p103_p0, %s937_s18, %s105_s7  }
  0x23   : > { %s1124_s0 = scalar_select %p133_p1, %s929_s16, %s135_s11  }
  0x24   : > { %p1126_p2 = por %p152_p12, %p151_p11  ;;  %p642_p3 = scmp.ge.s32.totalorder %s973_s26, 16 }
  0x26   : > { %171 = sbr.rel (%p642_p3) target bundleno = 82 (0x52), region = 20 }
  0x2b   : > { %174 = sbr.rel (!%p1087_p4) target bundleno = 55 (0x37), region = 24  ;;  %s176_s28 = sand.u32 (%p1087_p4), 1, %s945_s20  }
  0x2c   : > { %s644_s3 = sshll.u32 (%p1087_p4), %s969_s25, 3  ;;  %s643_s29 = sshll.u32 (%p1087_p4), %s176_s28, 3 }
  0x2d   : > { %s183_s30 = sadd.s32 (%p1087_p4), %s961_s23, %s644_s3  ;;  %s1269_s1 = sld [smem:[#allocation14_spill]] (%p1087_p4) }
  0x2e   : > { %s645_s5 = sshll.u32 (%p1087_p4), %s183_s30, 2  ;;  %s178_s11 = scalar_lea.vmem (%p1087_p4), [#allocation4], %s643_s29 }
  0x33   : > { %s185_s9 = scalar_lea.vmem %s1269_s1, %s645_s5 }
  0x34   : > { %v202_v0 = vld [vmem:[%s185_s9] sm:$0xf]  ;;  %v204_v1 = vld [vmem:[%s185_s9 + $0x10] sm:$0xf] }
  0x35   : > { %203 = vst [vmem:[%s178_s11] sm:$0xf] %v202_v0 }
  0x36   : > { %205 = vst [vmem:[%s178_s11 + $0x4] sm:$0xf] %v204_v1 }
  0x37 PF: > { %233 = sbr.rel (!%p1098_p6) target bundleno = 82 (0x52), region = 65  ;;  %s235_s8 = sand.u32 (%p1098_p6), 1, %s937_s18  }
  0x38   : > { %s698_s13 = sshll.u32 (%p1098_p6), %s961_s23, 5  ;;  %s646_s28 = sshll.u32 (%p1098_p6), %s235_s8, 6 }
  0x39   : > { %s240_s3 = sadd.s32 (%p1098_p6), %s965_s24, %s698_s13  ;;  %s649_s30 = sshll.u32 (%p1098_p6), %s969_s25, 7 }
  0x3a   : > { %s242_s6 = sadd.s32 (%p1098_p6), %s649_s30, %s240_s3  ;;  %s1270_s2 = sld [smem:[#allocation15_spill]] (%p1098_p6) }
  0x3b   : > { %s650_s5 = sshll.u32 (%p1098_p6), %s242_s6, 2  ;;  %s237_s10 = scalar_lea.vmem (%p1098_p6), [#allocation5], %s646_s28 }
  0x40   : > { %s1148_s29 = scalar_lea.vmem %s1270_s2, %s650_s5 }
  0x41   : > { %v261_v2 = vld [vmem:[%s1148_s29] sm:$0xf]  ;;  %v263_v3 = vld [vmem:[%s1148_s29 + $0x8] sm:$0xf]  ;;  %v265_v4 = vld [vmem:[%s1148_s29 + $0x10] sm:$0xf] }
  0x42   : > { %262 = vst [vmem:[%s237_s10] sm:$0xf] %v261_v2  ;;  %v267_v5 = vld [vmem:[%s1148_s29 + $0x18] sm:$0xf]  ;;  %v269_v6 = vld [vmem:[%s1148_s29 + $0x20] sm:$0xf] }
  0x43   : > { %264 = vst [vmem:[%s237_s10 + $0x4] sm:$0xf] %v263_v3  ;;  %v271_v7 = vld [vmem:[%s1148_s29 + $0x28] sm:$0xf]  ;;  %v273_v8 = vld [vmem:[%s1148_s29 + $0x30] sm:$0xf] }
  0x44   : > { %266 = vst [vmem:[%s237_s10 + $0x8] sm:$0xf] %v265_v4  ;;  %v275_v9 = vld [vmem:[%s1148_s29 + $0x38] sm:$0xf]  ;;  %v277_v10 = vld [vmem:[%s1148_s29 + $0x40] sm:$0xf] }
  0x45   : > { %268 = vst [vmem:[%s237_s10 + $0xc] sm:$0xf] %v267_v5  ;;  %v279_v11 = vld [vmem:[%s1148_s29 + $0x48] sm:$0xf]  ;;  %v281_v12 = vld [vmem:[%s1148_s29 + $0x50] sm:$0xf] }
  0x46   : > { %270 = vst [vmem:[%s237_s10 + $0x10] sm:$0xf] %v269_v6  ;;  %v283_v13 = vld [vmem:[%s1148_s29 + $0x58] sm:$0xf]  ;;  %v285_v14 = vld [vmem:[%s1148_s29 + $0x60] sm:$0xf] }
  0x47   : > { %272 = vst [vmem:[%s237_s10 + $0x14] sm:$0xf] %v271_v7  ;;  %v287_v15 = vld [vmem:[%s1148_s29 + $0x68] sm:$0xf]  ;;  %v289_v16 = vld [vmem:[%s1148_s29 + $0x70] sm:$0xf] }
  0x48   : > { %274 = vst [vmem:[%s237_s10 + $0x18] sm:$0xf] %v273_v8  ;;  %v291_v17 = vld [vmem:[%s1148_s29 + $0x78] sm:$0xf] }
  0x49   : > { %276 = vst [vmem:[%s237_s10 + $0x1c] sm:$0xf] %v275_v9 }
  0x4a   : > { %278 = vst [vmem:[%s237_s10 + $0x20] sm:$0xf] %v277_v10 }
  0x4b   : > { %280 = vst [vmem:[%s237_s10 + $0x24] sm:$0xf] %v279_v11 }
  0x4c   : > { %282 = vst [vmem:[%s237_s10 + $0x28] sm:$0xf] %v281_v12 }
  0x4d   : > { %284 = vst [vmem:[%s237_s10 + $0x2c] sm:$0xf] %v283_v13 }
  0x4e   : > { %286 = vst [vmem:[%s237_s10 + $0x30] sm:$0xf] %v285_v14 }
  0x4f   : > { %288 = vst [vmem:[%s237_s10 + $0x34] sm:$0xf] %v287_v15 }
  0x50   : > { %290 = vst [vmem:[%s237_s10 + $0x38] sm:$0xf] %v289_v16 }
  0x51   : > { %292 = vst [vmem:[%s237_s10 + $0x3c] sm:$0xf] %v291_v17 }
  0x52 PF: > { %p651_p4 = scmp.ge.s32.totalorder %s973_s26, 1  ;;  %p347_p5 = scmp.lt.s32.totalorder %s973_s26, 17 }
  0x54   : > { %p348_p6 = pnand %p651_p4, %p347_p5 }
  0x55   : > { %s354_s11 = sand.u32 (!%p348_p6), 1, %s941_s19   ;;  %s361_s8 = sand.u32 (!%p348_p6), 1, %s933_s17  }
  0x56   : > { %351 = sbr.rel (%p348_p6) target bundleno = 310 (0x136), region = 106  ;;  %s652_s13 = sshll.u32 (!%p348_p6), %s354_s11, 3 }
  0x57   : > { %s653_s28 = sshll.u32 (!%p348_p6), %s361_s8, 6  ;;  %s385_s3 = sand.u32 (!%p348_p6), 1, %s925_s15  }
  0x58   : > { %s654_s30 = sshll.u32 (!%p348_p6), %s385_s3, 4  ;;  %s356_s6 = scalar_lea.vmem (!%p348_p6), [#allocation4], %s652_s13 }
  0x59   : > { %s363_s5 = scalar_lea.vmem (!%p348_p6), [#allocation5], %s653_s28  ;;  %s1173_s7 = scalar_lea.vmem (!%p348_p6), [#allocation6], %s654_s30 }
  0x5a   : > { %s1271_s9 = sld [smem:[#allocation9_spill]] (!%p348_p6) }
  0x60   : > { %p655_p7 = scmp.ne.s32.totalorder %s1271_s9, 0 }
  0x62   : > { %394 = sbr.rel (%p655_p7) target bundleno = 106 (0x6a), region = 118 }
  0x67   : > { %v975_v18 = vmov 0.0  }
  0x68   : > { %395 = vst [vmem:[#allocation2] sm:$0xff] %v975_v18 }
  0x69   : > { %396 = vst [vmem:[#allocation2 + $0x8] sm:$0xff] %v975_v18 }
  0x6a PF: > { %v707_v19 = vld [vmem:[%s363_s5 + $0x38] sm:$0xff]  ;;  %v706_v20 = vld [vmem:[%s363_s5 + $0x30] sm:$0xff]  ;;  %v705_v21 = vld [vmem:[%s363_s5 + $0x28] sm:$0xff]  ;;  %s1272_s17 = sld [smem:[#allocation9_spill]] }
  0x6b   : > { %471 = vmatpush.bf16.msra.mxu0 %v707_v19  ;;  %v704_v22 = vld [vmem:[%s363_s5 + $0x20] sm:$0xff]  ;;  %v703_v23 = vld [vmem:[%s363_s5 + $0x18] sm:$0xff]  ;;  %v702_v24 = vld [vmem:[%s363_s5 + $0x10] sm:$0xff] }
  0x6c   : > { %v701_v25 = vld [vmem:[%s363_s5 + $0x8] sm:$0xff]  ;;  %v700_v26 = vld [vmem:[%s363_s5] sm:$0xff]  ;;  %v699_v27 = vld [vmem:[%s356_s6] sm:$0xff] }
  0x6f   : > { %472 = vmatpush.bf16.msra.mxu0 %v706_v20  ;;  %v397_v28 = vld [vmem:[#allocation2] sm:$0xff] }
  0x70   : > { %v398_v31 = vld [vmem:[#allocation2 + $0x8] sm:$0xff]  ;;  %p692_p8 = scmp.ne.s32.totalorder %s1272_s17, 3 }
  0x71   : > { %s495_s19 = sld [smem:[#allocation3]] (!%p692_p8) }
  0x73   : > { %473 = vmatpush.bf16.msra.mxu0 %v705_v21 }
  0x77   : > { %474 = vmatpush.bf16.msra.mxu0 %v704_v22 }
  0x7b   : > { %475 = vmatpush.bf16.msra.mxu0 %v703_v23 }
  0x7f   : > { %476 = vmatpush.bf16.msra.mxu0 %v702_v24 }
  0x83   : > { %477 = vmatpush.bf16.msra.mxu0 %v701_v25 }
  0x87   : > { %478 = vmatpush.bf16.msra.mxu0 %v700_v26 }
  0x8a   : > { %479 = vmatmul.bf16.vlgmr.msra.gmra.mxu0 %v699_v27 }
 0x107   : > { %v480_v29 = vpop.f32.mrf.mxu0 }
 0x108   : > { %v485_v30 = vadd.f32 %v480_v29, %v397_v28 }
 0x10a   : > { %487 = vst [vmem:[#allocation2] sm:$0xff] %v485_v30 }
 0x10e   : > { %492 = sbr.rel (%p692_p8) target bundleno = 285 (0x11d), region = 122 }
 0x10f   : > { %v482_v32 = vpop.f32.mrf.mxu0 }
 0x110   : > { %v486_v33 = vadd.f32 %v482_v32, %v398_v31 }
 0x112   : > { %488 = vst [vmem:[#allocation2 + $0x8] sm:$0xff] %v486_v33 }
 0x113   : > { %v493_v34 = vld [vmem:[#allocation2] sm:$0xff]  ;;  %v496_v36 = vstv %s495_s19 }
 0x114   : > { %v497_v37 = vmul.f32 %v496_v36, %v493_v34 }
 0x116   : > { %499 = vst [vmem:[%s1173_s7] sm:$0xff] %v497_v37 }
 0x119   : > { %v494_v35 = vld [vmem:[#allocation2 + $0x8] sm:$0xff] }
 0x11a   : > { %v498_v38 = vmul.f32 %v496_v36, %v494_v35 }
 0x11c   : > { %500 = vst [vmem:[%s1173_s7 + $0x8] sm:$0xff] %v498_v38 }
 0x11d PF: > { %s1273_s29 = sld [smem:[#allocation11_spill]]  ;;  %s518_s13 = sshll.u32 %s1173_s7, 4  ;;  %s519_s13 = int_to_ptr.vmem [resolvable:$true] %s518_s13 }
 0x11e   : > { %s1274_s10 = sld [smem:[#allocation10_spill]]  ;;  %s502_s19 = scalar_lea.sflag [#allocation7], %s385_s3 }
 0x11f   : > { %s1275_s5 = sld [smem:[#allocation16_spill]] }
 0x123   : > { %s694_s11 = sshll.u32 %s1273_s29, 2 }
 0x124   : > { %s515_s8 = sadd.s32 %s1274_s10, %s694_s11 }
 0x125   : > { %s695_s28 = sshll.u32 %s515_s8, 3  ;;  %s851_s7 = scalar_lea.hbm %s1275_s5, 64 }
 0x126   : > { %s517_s9 = scalar_lea.hbm %s1275_s5, %s695_s28 }
 0x127   : > { %s520_s17 = sshll.u32 %s517_s9, 4  ;;  %s521_s17 = int_to_ptr.hbm [resolvable:$true] %s520_s17 }
 0x128   : > { %s845_s1 = sshra.s32 %s521_s17, 4  ;;  %s846_s1 = int_to_ptr.hbm [resolvable:$true] %s845_s1 }
 0x129   : > { %s847_s2 = scalar_lea.hbm %s846_s1, 16  ;;  %p852_p13 = scmp.lt.s32.totalorder %s846_s1, %s1275_s5 }
 0x12a   : > { %p848_p9 = scmp.ne.s32.totalorder %s846_s1, %s847_s2  ;;  %p853_p0 = scmp.lt.s32.totalorder %s851_s7, %s847_s2 }
 0x12c   : > { %p849_p11 = pnand %p848_p9, %p1107_p10  ;;  %p854_p1 = por %p853_p0, %p852_p13 }
 0x12e   : > { %p850_p12 = pneg %p849_p11 }
 0x130   : > { %p855_p3 = pnand %p854_p1, %p850_p12 }
 0x132   : > { %858 = shalt.err (!%p855_p3)
}
 0x133   : > { %s976_s3 = smov 128   ;;  %s977_s28 = smov 256  }
 0x134   : > { %s978_s30 = smov 8  }
 0x135   : > { %708 = dma.vmem_to_hbm [thread:$0]  (%p1107_p10), %s519_s13, 256, %s521_s17, %s502_s19, %s976_s3, %s977_s28, %s978_s30  }
 0x136 PF: > { %p714_p4 = scmp.ge.s32.totalorder %s973_s26, 2  ;;  %s535_s6 = sand.u32 1, %s921_s14  }
 0x137   : > { %s536_s1 = scalar_lea.sflag [#allocation7], %s535_s6 }
 0x138   : > { %p711_p5 = pnand %p714_p4, %p1126_p2 }
 0x13a   : > { %p712_p6 = pneg %p711_p5 }
 0x13c   : > { %916 = dma.done.wait (%p712_p6), %s536_s1, 256  }
 0x13d   : > { %918 = vsyncadd (%p712_p6), %s536_s1, 4294967040  ;;  %s17_s26 = sadd.s32 1, %s973_s26   ;;  %s1277_s12 = sld [smem:[#allocation12_spill]] }
 0x13e   : > { %p1202_p7 = scmp.ge.s32.totalorder %s17_s26, 18   ;;  %s1278_s13 = sld [smem:[#allocation13_spill]] }
 0x13f   : > { %s1279_s14 = smov %s925_s15  ;;  %s1280_s15 = smov %s929_s16 }
 0x140   : > { %s1281_s16 = smov %s1124_s0  ;;  %s1282_s17 = smov %s937_s18 }
 0x141   : > { %s1283_s18 = smov %s1121_s27  ;;  %s1284_s19 = smov %s945_s20 }
 0x142   : > { %s1285_s20 = smov %s1118_s22  ;;  %s1286_s21 = smov %s961_s23 }
 0x143   : > { %s1287_s22 = smov %s965_s24  ;;  %s1288_s0 = smov %s969_s25 }
 0x144   : > { %s1289_s23 = smov %s1277_s12  ;;  %s1290_s24 = smov %s1278_s13 }
 0x145   : > { %s1291_s25 = smov %s1301_s4  ;;  %16 = sbr.rel (!%p1202_p7) target bundleno = 13 (0xd), region = 170 }
 0x14a   :  { %542 = vsyncpa [#allocation7], 1 }
 0x14b   :  { %544 = vsyncpa [#allocation7 + $0x1], 1 }

// kernel: quantized_matmul.4
= control target key start
LH: loop header
LB: loop body
LE: loop exit
PB: predicated region body
PF: predicated region fallthrough
CT: control target
= control target key end

     0   :  { %s1261_s11 = smov 0   ;;  %s1263_s12 = smov 0   ;;  %s1854_s0 = inlined_call_operand.<no memory space> [shape: f32[1], index: 0, kind: input, shape index: {}]   ;;  %s1855_s1 = inlined_call_operand.vmem [shape: f32[1024,256], index: 1, kind: input, shape index: {}]   ;;  %s1856_s2 = inlined_call_operand.vmem [shape: bf16[1024,256], index: 2, kind: output, shape index: {}]  }
   0x1   :  { %7 = sst [smem:[#allocation2]] %s1854_s0  ;;  %s1265_s13 = smov 0  }
   0x2 LB: > { %s25_s0 = sadd.s32 1, %s1237_s12  ;;  %p672_p0 = scmp.ge.s32.totalorder %s1241_s13, 1  ;;  %s1241_s13 = sphi %s1265_s13, %s13_s13   ;;  %s1237_s12 = sphi %s1263_s12, %s1976_s12   ;;  %s1233_s11 = sphi %s1261_s11, %s1975_s11  }
   0x3   : > { %p27_p1 = scmp.ge.s32.totalorder %s25_s0, 4  ;;  %p136_p2 = scmp.lt.s32.totalorder %s1241_s13, 5 }
   0x5   : > { %s1978_s0 = smov (%p27_p1, %s25_s0), 0  ;;  %p137_p3 = pnand %p672_p0, %p136_p2 }
   0x6   : > { %s673_s14 = sshll.u32 (!%p137_p3), %s1233_s11, 5  ;;  %s192_s15 = sld [smem:[#allocation2]] (!%p137_p3) }
   0x7   : > { %140 = sbr.rel (%p137_p3) target bundleno = 209 (0xd1), region = 28  ;;  %p170_p4 = scmp.lt.s32.totalorder (!%p137_p3), %s673_s14, 127 }
   0xc   : > { %s1980_s14 = smov (!%p170_p4, %s673_s14), 127  ;;  %v1287_v0 = vstv %s192_s15 }
   0xd   : > { %s681_s16 = sshll.u32 %s1980_s14, 4  ;;  %s682_s20 = sshll.u32 %s1980_s14, 3 }
   0xe   : > { %s1285_s19 = scalar_lea.vmem %s1855_s1, %s681_s16  ;;  %s1351_s23 = scalar_lea.vmem %s1856_s2, %s682_s20 }
   0xf   : > { %v193_v1 = vld [vmem:[%s1285_s19] sm:$0xff]  ;;  %v194_v2 = vld [vmem:[%s1285_s19 + $0x8] sm:$0xff]  ;;  %v195_v3 = vld [vmem:[%s1285_s19 + $0x10] sm:$0xff] }
  0x10   : > { %v258_v4 = vmul.f32 %v1287_v0, %v193_v1  ;;  %v259_v5 = vmul.f32 %v1287_v0, %v194_v2  ;;  %v196_v6 = vld [vmem:[%s1285_s19 + $0x18] sm:$0xff]  ;;  %v260_v7 = vmul.f32 %v1287_v0, %v195_v3  ;;  %v197_v8 = vld [vmem:[%s1285_s19 + $0x20] sm:$0xff]  ;;  %v198_v9 = vld [vmem:[%s1285_s19 + $0x28] sm:$0xff] }
  0x11   : > { %v261_v10 = vmul.f32 %v1287_v0, %v196_v6  ;;  %v1300_v11 = vmul.f32 %v1287_v0, %v197_v8  ;;  %v1303_v12 = vmul.f32 %v1287_v0, %v198_v9  ;;  %v199_v49 = vld [vmem:[%s1285_s19 + $0x30] sm:$0xff]  ;;  %v200_v54 = vld [vmem:[%s1285_s19 + $0x38] sm:$0xff] }
  0x12   : > { %v683_v13 = vand.u32 2147483647, %v258_v4  ;;  %v685_v14 = vcvt.f32.s32 %v258_v4  ;;  %v688_v15 = vand.u32 2147483648, %v258_v4  ;;  %v691_v16 = vand.u32 2147483647, %v259_v5  ;;  %v203_v23 = vld [vmem:[%s1285_s19 + $0x50] sm:$0xff] }
  0x13   : > { %v693_v17 = vcvt.f32.s32 %v259_v5  ;;  %v696_v18 = vand.u32 2147483648, %v259_v5  ;;  %v699_v19 = vand.u32 2147483647, %v260_v7  ;;  %v701_v20 = vcvt.f32.s32 %v260_v7  ;;  %v204_v39 = vld [vmem:[%s1285_s19 + $0x58] sm:$0xff] }
  0x14   : > { %vm1305_vm0 = vcmp.lt.f32.partialorder %v683_v13, 8388608.0  ;;  %v686_v22 = vcvt.s32.f32 %v685_v14  ;;  %vm1309_vm1 = vcmp.lt.f32.partialorder %v691_v16, 8388608.0  ;;  %v704_v24 = vand.u32 2147483648, %v260_v7  ;;  %v201_v14 = vld [vmem:[%s1285_s19 + $0x40] sm:$0xff] }
  0x15   : > { %v694_v25 = vcvt.s32.f32 %v693_v17  ;;  %vm1313_vm2 = vcmp.lt.f32.partialorder %v699_v19, 8388608.0  ;;  %v702_v27 = vcvt.s32.f32 %v701_v20  ;;  %v707_v28 = vand.u32 2147483647, %v261_v10  ;;  %v202_v19 = vld [vmem:[%s1285_s19 + $0x48] sm:$0xff] }
  0x16   : > { %v687_v29 = vand.u32 2147483647, %v686_v22  ;;  %v709_v30 = vcvt.f32.s32 %v261_v10  ;;  %v712_v31 = vand.u32 2147483648, %v261_v10  ;;  %v715_v32 = vand.u32 2147483647, %v1300_v11 }
  0x17   : > { %v695_v33 = vand.u32 2147483647, %v694_v25  ;;  %v703_v34 = vand.u32 2147483647, %v702_v27  ;;  %vm1318_vm3 = vcmp.lt.f32.partialorder %v707_v28, 8388608.0  ;;  %v717_v36 = vcvt.f32.s32 %v1300_v11 }
  0x18   : > { %v689_v37 = vor.u32 %v688_v15, %v687_v29  ;;  %v710_v38 = vcvt.s32.f32 %v709_v30  ;;  %vm1323_vm4 = vcmp.lt.f32.partialorder %v715_v32, 8388608.0  ;;  %v720_v40 = vand.u32 2147483648, %v1300_v11 }
  0x19   : > { %v697_v41 = vor.u32 %v696_v18, %v695_v33  ;;  %v705_v42 = vor.u32 %v704_v24, %v703_v34  ;;  %v718_v43 = vcvt.s32.f32 %v717_v36  ;;  %v723_v44 = vand.u32 2147483647, %v1303_v12 }
  0x1a   : > { %v690_v45 = vsel %vm1305_vm0, %v689_v37, %v258_v4  ;;  %v711_v46 = vand.u32 2147483647, %v710_v38  ;;  %v725_v47 = vcvt.f32.s32 %v1303_v12  ;;  %v728_v48 = vand.u32 2147483648, %v1303_v12 }
  0x1b   : > { %v698_v50 = vsel %vm1309_vm1, %v697_v41, %v259_v5  ;;  %v386_v51 = vmax.f32 %v690_v45, -128.0  ;;  %v706_v52 = vsel %vm1313_vm2, %v705_v42, %v260_v7  ;;  %v719_v53 = vand.u32 2147483647, %v718_v43 }
  0x1c   : > { %v387_v55 = vmax.f32 %v698_v50, -128.0  ;;  %v713_v56 = vor.u32 %v712_v31, %v711_v46  ;;  %v388_v57 = vmax.f32 %v706_v52, -128.0  ;;  %vm1340_vm5 = vcmp.lt.f32.partialorder %v723_v44, 8388608.0 }
  0x1d   : > { %v450_v59 = vmin.f32 %v386_v51, 127.0  ;;  %v721_v60 = vor.u32 %v720_v40, %v719_v53  ;;  %v726_v61 = vcvt.s32.f32 %v725_v47  ;;  %v264_v62 = vmul.f32 %v1287_v0, %v199_v49 }
  0x1e   : > { %v451_v63 = vmin.f32 %v387_v55, 127.0  ;;  %v714_v1 = vsel %vm1318_vm3, %v713_v56, %v261_v10  ;;  %v452_v2 = vmin.f32 %v388_v57, 127.0  ;;  %v265_v3 = vmul.f32 %v1287_v0, %v200_v54 }
  0x1f   : > { %v389_v4 = vmax.f32 %v714_v1, -128.0  ;;  %v722_v5 = vsel %vm1323_vm4, %v721_v60, %v1300_v11  ;;  %v727_v6 = vand.u32 2147483647, %v726_v61  ;;  %v731_v7 = vand.u32 2147483647, %v264_v62  ;;  %v205_v1 = vld [vmem:[%s1285_s19 + $0x60] sm:$0xff] }
  0x20   : > { %v514_v8 = vpack.c.bf16 %v451_v63, %v450_v59  ;;  %v390_v9 = vmax.f32 %v722_v5, -128.0  ;;  %v733_v10 = vcvt.f32.s32 %v264_v62  ;;  %v736_v13 = vand.u32 2147483648, %v264_v62 }
  0x21   : > { %v453_v15 = vmin.f32 %v389_v4, 127.0  ;;  %v729_v16 = vor.u32 %v728_v48, %v727_v6  ;;  %vm1357_vm6 = vcmp.lt.f32.partialorder %v731_v7, 8388608.0  ;;  %v739_v18 = vand.u32 2147483647, %v265_v3 }
  0x22   : > { %546 = vst [vmem:[%s1351_s23] sm:$0xff] %v514_v8  ;;  %v454_v20 = vmin.f32 %v390_v9, 127.0  ;;  %v734_v11 = vcvt.s32.f32 %v733_v10  ;;  %v741_v21 = vcvt.f32.s32 %v265_v3  ;;  %v744_v22 = vand.u32 2147483648, %v265_v3 }
  0x23   : > { %v515_v24 = vpack.c.bf16 %v453_v15, %v452_v2  ;;  %v730_v25 = vsel %vm1340_vm5, %v729_v16, %v1303_v12  ;;  %vm1367_vm7 = vcmp.lt.f32.partialorder %v739_v18, 8388608.0  ;;  %v266_v27 = vmul.f32 %v1287_v0, %v201_v14  ;;  %v206_v2 = vld [vmem:[%s1285_s19 + $0x68] sm:$0xff] }
  0x24   : > { %v391_v28 = vmax.f32 %v730_v25, -128.0  ;;  %v735_v29 = vand.u32 2147483647, %v734_v11  ;;  %v742_v30 = vcvt.s32.f32 %v741_v21  ;;  %v267_v31 = vmul.f32 %v1287_v0, %v202_v19 }
  0x25   : > { %547 = vst [vmem:[%s1351_s23 + $0x8] sm:$0xff] %v515_v24  ;;  %v747_v32 = vand.u32 2147483647, %v266_v27  ;;  %v749_v33 = vcvt.f32.s32 %v266_v27  ;;  %v752_v34 = vand.u32 2147483648, %v266_v27  ;;  %v268_v35 = vmul.f32 %v1287_v0, %v203_v23 }
  0x26   : > { %v455_v36 = vmin.f32 %v391_v28, 127.0  ;;  %v737_v12 = vor.u32 %v736_v13, %v735_v29  ;;  %v743_v37 = vand.u32 2147483647, %v742_v30  ;;  %v755_v38 = vand.u32 2147483647, %v267_v31  ;;  %v207_v28 = vld [vmem:[%s1285_s19 + $0x70] sm:$0xff] }
  0x27   : > { %vm1376_vm8 = vcmp.lt.f32.partialorder %v747_v32, 8388608.0  ;;  %v750_v41 = vcvt.s32.f32 %v749_v33  ;;  %v757_v42 = vcvt.f32.s32 %v267_v31  ;;  %v760_v43 = vand.u32 2147483648, %v267_v31  ;;  %v208_v33 = vld [vmem:[%s1285_s19 + $0x78] sm:$0xff] }
  0x28   : > { %v516_v44 = vpack.c.bf16 %v455_v36, %v454_v20  ;;  %v738_v45 = vsel %vm1357_vm6, %v737_v12, %v264_v62  ;;  %v745_v46 = vor.u32 %v744_v22, %v743_v37  ;;  %vm1382_vm9 = vcmp.lt.f32.partialorder %v755_v38, 8388608.0  ;;  %v210_v36 = vld [vmem:[%s1285_s19 + $0x88] sm:$0xff] }
  0x29   : > { %v392_v48 = vmax.f32 %v738_v45, -128.0  ;;  %v751_v49 = vand.u32 2147483647, %v750_v41  ;;  %v758_v50 = vcvt.s32.f32 %v757_v42  ;;  %v269_v51 = vmul.f32 %v1287_v0, %v204_v39 }
  0x2a   : > { %548 = vst [vmem:[%s1351_s23 + $0x10] sm:$0xff] %v516_v44  ;;  %v746_v52 = vsel %vm1367_vm7, %v745_v46, %v265_v3  ;;  %v763_v53 = vand.u32 2147483647, %v268_v35  ;;  %v765_v54 = vcvt.f32.s32 %v268_v35  ;;  %v768_v55 = vand.u32 2147483648, %v268_v35 }
  0x2b   : > { %v393_v56 = vmax.f32 %v746_v52, -128.0  ;;  %v456_v57 = vmin.f32 %v392_v48, 127.0  ;;  %v753_v58 = vor.u32 %v752_v34, %v751_v49  ;;  %v759_v59 = vand.u32 2147483647, %v758_v50  ;;  %v209_v34 = vld [vmem:[%s1285_s19 + $0x80] sm:$0xff] }
  0x2c   : > { %vm1390_vm10 = vcmp.lt.f32.partialorder %v763_v53, 8388608.0  ;;  %v766_v61 = vcvt.s32.f32 %v765_v54  ;;  %v771_v62 = vand.u32 2147483647, %v269_v51  ;;  %v773_v63 = vcvt.f32.s32 %v269_v51 }
  0x2d   : > { %v457_v4 = vmin.f32 %v393_v56, 127.0  ;;  %v754_v3 = vsel %vm1376_vm8, %v753_v58, %v266_v27  ;;  %v761_v5 = vor.u32 %v760_v43, %v759_v59  ;;  %v776_v6 = vand.u32 2147483648, %v269_v51 }
  0x2e   : > { %v394_v7 = vmax.f32 %v754_v3, -128.0  ;;  %v767_v8 = vand.u32 2147483647, %v766_v61  ;;  %vm1398_vm11 = vcmp.lt.f32.partialorder %v771_v62, 8388608.0  ;;  %v774_v10 = vcvt.s32.f32 %v773_v63 }
  0x2f   : > { %v517_v13 = vpack.c.bf16 %v457_v4, %v456_v57  ;;  %v762_v14 = vsel %vm1382_vm9, %v761_v5, %v267_v31  ;;  %v270_v15 = vmul.f32 %v1287_v0, %v205_v1  ;;  %v271_v16 = vmul.f32 %v1287_v0, %v206_v2 }
  0x30   : > { %v395_v17 = vmax.f32 %v762_v14, -128.0  ;;  %v458_v18 = vmin.f32 %v394_v7, 127.0  ;;  %v769_v19 = vor.u32 %v768_v55, %v767_v8  ;;  %v775_v20 = vand.u32 2147483647, %v774_v10  ;;  %v211_v14 = vld [vmem:[%s1285_s19 + $0x90] sm:$0xff] }
  0x31   : > { %549 = vst [vmem:[%s1351_s23 + $0x18] sm:$0xff] %v517_v13  ;;  %v779_v11 = vand.u32 2147483647, %v270_v15  ;;  %v781_v21 = vcvt.f32.s32 %v270_v15  ;;  %v784_v22 = vand.u32 2147483648, %v270_v15  ;;  %v787_v23 = vand.u32 2147483647, %v271_v16 }
  0x32   : > { %v459_v24 = vmin.f32 %v395_v17, 127.0  ;;  %v770_v25 = vsel %vm1390_vm10, %v769_v19, %v268_v35  ;;  %v777_v26 = vor.u32 %v776_v6, %v775_v20  ;;  %v789_v27 = vcvt.f32.s32 %v271_v16 }
  0x33   : > { %v396_v29 = vmax.f32 %v770_v25, -128.0  ;;  %vm1410_vm12 = vcmp.lt.f32.partialorder %v779_v11, 8388608.0  ;;  %v782_v31 = vcvt.s32.f32 %v781_v21  ;;  %vm1414_vm13 = vcmp.lt.f32.partialorder %v787_v23, 8388608.0 }
  0x34   : > { %v518_v12 = vpack.c.bf16 %v459_v24, %v458_v18  ;;  %v778_v35 = vsel %vm1398_vm11, %v777_v26, %v269_v51  ;;  %v790_v37 = vcvt.s32.f32 %v789_v27  ;;  %v792_v38 = vand.u32 2147483648, %v271_v16  ;;  %v212_v18 = vld [vmem:[%s1285_s19 + $0x98] sm:$0xff]  ;;  %v213_v26 = vld [vmem:[%s1285_s19 + $0xa0] sm:$0xff] }
  0x35   : > { %v397_v39 = vmax.f32 %v778_v35, -128.0  ;;  %v460_v40 = vmin.f32 %v396_v29, 127.0  ;;  %v783_v41 = vand.u32 2147483647, %v782_v31  ;;  %v272_v42 = vmul.f32 %v1287_v0, %v207_v28 }
  0x36   : > { %550 = vst [vmem:[%s1351_s23 + $0x20] sm:$0xff] %v518_v12  ;;  %v791_v43 = vand.u32 2147483647, %v790_v37  ;;  %v273_v44 = vmul.f32 %v1287_v0, %v208_v33  ;;  %v274_v45 = vmul.f32 %v1287_v0, %v209_v34  ;;  %v1428_v46 = vmul.f32 %v1287_v0, %v210_v36  ;;  %v214_v37 = vld [vmem:[%s1285_s19 + $0xa8] sm:$0xff] }
  0x37   : > { %v461_v47 = vmin.f32 %v397_v39, 127.0  ;;  %v785_v48 = vor.u32 %v784_v22, %v783_v41  ;;  %v795_v49 = vand.u32 2147483647, %v272_v42  ;;  %v797_v50 = vcvt.f32.s32 %v272_v42 }
  0x38   : > { %v793_v51 = vor.u32 %v792_v38, %v791_v43  ;;  %v800_v52 = vand.u32 2147483648, %v272_v42  ;;  %v803_v53 = vand.u32 2147483647, %v273_v44  ;;  %v805_v54 = vcvt.f32.s32 %v273_v44 }
  0x39   : > { %v519_v55 = vpack.c.bf16 %v461_v47, %v460_v40  ;;  %v786_v56 = vsel %vm1410_vm12, %v785_v48, %v270_v15  ;;  %vm1432_vm14 = vcmp.lt.f32.partialorder %v795_v49, 8388608.0  ;;  %v798_v58 = vcvt.s32.f32 %v797_v50 }
  0x3a   : > { %v794_v59 = vsel %vm1414_vm13, %v793_v51, %v271_v16  ;;  %v398_v60 = vmax.f32 %v786_v56, -128.0  ;;  %vm1438_vm15 = vcmp.lt.f32.partialorder %v803_v53, 8388608.0  ;;  %v806_v62 = vcvt.s32.f32 %v805_v54 }
  0x3b   : > { %551 = vst [vmem:[%s1351_s23 + $0x28] sm:$0xff] %v519_v55  ;;  %v399_v63 = vmax.f32 %v794_v59, -128.0  ;;  %v799_v1 = vand.u32 2147483647, %v798_v58  ;;  %v808_v2 = vand.u32 2147483648, %v273_v44  ;;  %v813_v4 = vcvt.f32.s32 %v274_v45 }
  0x3c   : > { %v462_v3 = vmin.f32 %v398_v60, 127.0  ;;  %v807_v5 = vand.u32 2147483647, %v806_v62  ;;  %v811_v6 = vand.u32 2147483647, %v274_v45  ;;  %v816_v7 = vand.u32 2147483648, %v274_v45 }
  0x3d   : > { %v463_v8 = vmin.f32 %v399_v63, 127.0  ;;  %v801_v9 = vor.u32 %v800_v52, %v799_v1  ;;  %v814_v10 = vcvt.s32.f32 %v813_v4  ;;  %v819_v13 = vand.u32 2147483647, %v1428_v46  ;;  %v215_v63 = vld [vmem:[%s1285_s19 + $0xb0] sm:$0xff]  ;;  %v216_v1 = vld [vmem:[%s1285_s19 + $0xb8] sm:$0xff] }
  0x3e   : > { %v809_v15 = vor.u32 %v808_v2, %v807_v5  ;;  %vm1445_vm0 = vcmp.lt.f32.partialorder %v811_v6, 8388608.0  ;;  %v821_v17 = vcvt.f32.s32 %v1428_v46  ;;  %v824_v21 = vand.u32 2147483648, %v1428_v46  ;;  %v217_v6 = vld [vmem:[%s1285_s19 + $0xc0] sm:$0xff] }
  0x3f   : > { %v520_v19 = vpack.c.bf16 %v463_v8, %v462_v3  ;;  %v802_v20 = vsel %vm1432_vm14, %v801_v9, %v272_v42  ;;  %v815_v11 = vand.u32 2147483647, %v814_v10  ;;  %v276_v25 = vmul.f32 %v1287_v0, %v211_v14 }
  0x40   : > { %v810_v22 = vsel %vm1438_vm15, %v809_v15, %v273_v44  ;;  %v400_v23 = vmax.f32 %v802_v20, -128.0  ;;  %v822_v24 = vcvt.s32.f32 %v821_v17  ;;  %vm1459_vm1 = vcmp.lt.f32.partialorder %v819_v13, 8388608.0  ;;  %v218_v17 = vld [vmem:[%s1285_s19 + $0xc8] sm:$0xff]  ;;  %v219_v44 = vld [vmem:[%s1285_s19 + $0xd0] sm:$0xff]  ;;  %v221_v13 = vld [vmem:[%s1285_s19 + $0xe0] sm:$0xff] }
  0x41   : > { %552 = vst [vmem:[%s1351_s23 + $0x30] sm:$0xff] %v520_v19  ;;  %v401_v27 = vmax.f32 %v810_v22, -128.0  ;;  %v817_v28 = vor.u32 %v816_v7, %v815_v11  ;;  %v277_v30 = vmul.f32 %v1287_v0, %v212_v18  ;;  %v827_v33 = vand.u32 2147483647, %v276_v25 }
  0x42   : > { %v464_v31 = vmin.f32 %v400_v23, 127.0  ;;  %v823_v32 = vand.u32 2147483647, %v822_v24  ;;  %v829_v34 = vcvt.f32.s32 %v276_v25  ;;  %v832_v35 = vand.u32 2147483648, %v276_v25 }
  0x43   : > { %v465_v36 = vmin.f32 %v401_v27, 127.0  ;;  %v818_v12 = vsel %vm1445_vm0, %v817_v28, %v274_v45  ;;  %v278_v38 = vmul.f32 %v1287_v0, %v213_v26  ;;  %v835_v42 = vand.u32 2147483647, %v277_v30 }
  0x44   : > { %v825_v39 = vor.u32 %v824_v21, %v823_v32  ;;  %v402_v40 = vmax.f32 %v818_v12, -128.0  ;;  %v830_v41 = vcvt.s32.f32 %v829_v34  ;;  %vm1468_vm2 = vcmp.lt.f32.partialorder %v827_v33, 8388608.0 }
  0x45   : > { %v521_v43 = vpack.c.bf16 %v465_v36, %v464_v31  ;;  %v837_v47 = vcvt.f32.s32 %v277_v30  ;;  %v840_v48 = vand.u32 2147483648, %v277_v30  ;;  %v279_v51 = vmul.f32 %v1287_v0, %v214_v37 }
  0x46   : > { %v826_v45 = vsel %vm1459_vm1, %v825_v39, %v1428_v46  ;;  %v466_v49 = vmin.f32 %v402_v40, 127.0  ;;  %v831_v50 = vand.u32 2147483647, %v830_v41  ;;  %v843_v54 = vand.u32 2147483647, %v278_v38 }
  0x47   : > { %553 = vst [vmem:[%s1351_s23 + $0x38] sm:$0xff] %v521_v43  ;;  %v403_v52 = vmax.f32 %v826_v45, -128.0  ;;  %v838_v53 = vcvt.s32.f32 %v837_v47  ;;  %v845_v55 = vcvt.f32.s32 %v278_v38  ;;  %vm1477_vm3 = vcmp.lt.f32.partialorder %v835_v42, 8388608.0 }
  0x48   : > { %v833_v56 = vor.u32 %v832_v35, %v831_v50  ;;  %v851_v58 = vand.u32 2147483647, %v279_v51  ;;  %v853_v59 = vcvt.f32.s32 %v279_v51  ;;  %v848_v62 = vand.u32 2147483648, %v278_v38  ;;  %v220_v50 = vld [vmem:[%s1285_s19 + $0xd8] sm:$0xff] }
  0x49   : > { %v467_v46 = vmin.f32 %v403_v52, 127.0  ;;  %v839_v60 = vand.u32 2147483647, %v838_v53  ;;  %v846_v61 = vcvt.s32.f32 %v845_v55  ;;  %vm1485_vm4 = vcmp.lt.f32.partialorder %v843_v54, 8388608.0 }
  0x4a   : > { %v834_v2 = vsel %vm1468_vm2, %v833_v56, %v276_v25  ;;  %v854_v3 = vcvt.s32.f32 %v853_v59  ;;  %v856_v5 = vand.u32 2147483648, %v279_v51  ;;  %vm1490_vm5 = vcmp.lt.f32.partialorder %v851_v58, 8388608.0 }
  0x4b   : > { %v522_v7 = vpack.c.bf16 %v467_v46, %v466_v49  ;;  %v841_v8 = vor.u32 %v840_v48, %v839_v60  ;;  %v404_v9 = vmax.f32 %v834_v2, -128.0  ;;  %v847_v10 = vand.u32 2147483647, %v846_v61 }
  0x4c   : > { %v855_v14 = vand.u32 2147483647, %v854_v3  ;;  %v280_v15 = vmul.f32 %v1287_v0, %v215_v63  ;;  %v281_v16 = vmul.f32 %v1287_v0, %v216_v1  ;;  %v1501_v11 = vmul.f32 %v1287_v0, %v217_v6 }
  0x4d   : > { %554 = vst [vmem:[%s1351_s23 + $0x40] sm:$0xff] %v522_v7  ;;  %v842_v18 = vsel %vm1477_vm3, %v841_v8, %v277_v30  ;;  %v468_v19 = vmin.f32 %v404_v9, 127.0  ;;  %v849_v20 = vor.u32 %v848_v62, %v847_v10  ;;  %v283_v28 = vmul.f32 %v1287_v0, %v218_v17 }
  0x4e   : > { %v405_v21 = vmax.f32 %v842_v18, -128.0  ;;  %v857_v22 = vor.u32 %v856_v5, %v855_v14  ;;  %v859_v23 = vand.u32 2147483647, %v280_v15  ;;  %v861_v24 = vcvt.f32.s32 %v280_v15  ;;  %v222_v18 = vld [vmem:[%s1285_s19 + $0xe8] sm:$0xff] }
  0x4f   : > { %v850_v25 = vsel %vm1485_vm4, %v849_v20, %v278_v38  ;;  %v864_v26 = vand.u32 2147483648, %v280_v15  ;;  %v869_v27 = vcvt.f32.s32 %v281_v16  ;;  %v867_v32 = vand.u32 2147483647, %v281_v16 }
  0x50   : > { %v469_v29 = vmin.f32 %v405_v21, 127.0  ;;  %v858_v30 = vsel %vm1490_vm5, %v857_v22, %v279_v51  ;;  %v406_v31 = vmax.f32 %v850_v25, -128.0  ;;  %vm1508_vm6 = vcmp.lt.f32.partialorder %v859_v23, 8388608.0 }
  0x51   : > { %v407_v33 = vmax.f32 %v858_v30, -128.0  ;;  %v862_v36 = vcvt.s32.f32 %v861_v24  ;;  %v870_v12 = vcvt.s32.f32 %v869_v27  ;;  %v872_v38 = vand.u32 2147483648, %v281_v16 }
  0x52   : > { %v523_v35 = vpack.c.bf16 %v469_v29, %v468_v19  ;;  %v470_v37 = vmin.f32 %v406_v31, 127.0  ;;  %v875_v39 = vand.u32 2147483647, %v1501_v11  ;;  %v877_v43 = vcvt.f32.s32 %v1501_v11  ;;  %v223_v19 = vld [vmem:[%s1285_s19 + $0xf0] sm:$0xff] }
  0x53   : > { %v471_v40 = vmin.f32 %v407_v33, 127.0  ;;  %v863_v41 = vand.u32 2147483647, %v862_v36  ;;  %v871_v42 = vand.u32 2147483647, %v870_v12  ;;  %vm1516_vm7 = vcmp.lt.f32.partialorder %v867_v32, 8388608.0 }
  0x54   : > { %555 = vst [vmem:[%s1351_s23 + $0x48] sm:$0xff] %v523_v35  ;;  %v880_v48 = vand.u32 2147483648, %v1501_v11  ;;  %v883_v45 = vand.u32 2147483647, %v283_v28  ;;  %v885_v49 = vcvt.f32.s32 %v283_v28  ;;  %v878_v54 = vcvt.s32.f32 %v877_v43 }
  0x55   : > { %v524_v51 = vpack.c.bf16 %v471_v40, %v470_v37  ;;  %v865_v52 = vor.u32 %v864_v26, %v863_v41  ;;  %v873_v53 = vor.u32 %v872_v38, %v871_v42  ;;  %vm1522_vm8 = vcmp.lt.f32.partialorder %v875_v39, 8388608.0 }
  0x56   : > { %v886_v56 = vcvt.s32.f32 %v885_v49  ;;  %v888_v57 = vand.u32 2147483648, %v283_v28  ;;  %v284_v58 = vmul.f32 %v1287_v0, %v219_v44  ;;  %v879_v60 = vand.u32 2147483647, %v878_v54 }
  0x57   : > { %556 = vst [vmem:[%s1351_s23 + $0x50] sm:$0xff] %v524_v51  ;;  %v866_v59 = vsel %vm1508_vm6, %v865_v52, %v280_v15  ;;  %v874_v46 = vsel %vm1516_vm7, %v873_v53, %v281_v16  ;;  %v285_v61 = vmul.f32 %v1287_v0, %v220_v50  ;;  %vm1533_vm9 = vcmp.lt.f32.partialorder %v883_v45, 8388608.0  ;;  %v225_v52 = vld [vmem:[%s1285_s19 + $0x100] sm:$0xff] }
  0x58   : > { %v408_v62 = vmax.f32 %v866_v59, -128.0  ;;  %v409_v63 = vmax.f32 %v874_v46, -128.0  ;;  %v887_v1 = vand.u32 2147483647, %v886_v56  ;;  %v891_v2 = vand.u32 2147483647, %v284_v58 }
  0x59   : > { %v881_v4 = vor.u32 %v880_v48, %v879_v60  ;;  %v893_v5 = vcvt.f32.s32 %v284_v58  ;;  %v896_v6 = vand.u32 2147483648, %v284_v58  ;;  %v899_v10 = vand.u32 2147483647, %v285_v61 }
  0x5a   : > { %v472_v7 = vmin.f32 %v408_v62, 127.0  ;;  %v473_v8 = vmin.f32 %v409_v63, 127.0  ;;  %v889_v9 = vor.u32 %v888_v57, %v887_v1  ;;  %vm1541_vm10 = vcmp.lt.f32.partialorder %v891_v2, 8388608.0  ;;  %v226_v1 = vld [vmem:[%s1285_s19 + $0x108] sm:$0xff] }
  0x5b   : > { %v882_v14 = vsel %vm1522_vm8, %v881_v4, %v1501_v11  ;;  %v894_v16 = vcvt.s32.f32 %v893_v5  ;;  %v901_v17 = vcvt.f32.s32 %v285_v61  ;;  %v904_v23 = vand.u32 2147483648, %v285_v61  ;;  %v224_v11 = vld [vmem:[%s1285_s19 + $0xf8] sm:$0xff] }
  0x5c   : > { %v525_v20 = vpack.c.bf16 %v473_v8, %v472_v7  ;;  %v890_v21 = vsel %vm1533_vm9, %v889_v9, %v283_v28  ;;  %v410_v22 = vmax.f32 %v882_v14, -128.0  ;;  %v286_v27 = vmul.f32 %v1287_v0, %v221_v13 }
  0x5d   : > { %v411_v24 = vmax.f32 %v890_v21, -128.0  ;;  %v895_v25 = vand.u32 2147483647, %v894_v16  ;;  %v902_v26 = vcvt.s32.f32 %v901_v17  ;;  %vm1552_vm11 = vcmp.lt.f32.partialorder %v899_v10, 8388608.0 }
  0x5e   : > { %557 = vst [vmem:[%s1351_s23 + $0x58] sm:$0xff] %v525_v20  ;;  %v474_v29 = vmin.f32 %v410_v22, 127.0  ;;  %v287_v31 = vmul.f32 %v1287_v0, %v222_v18  ;;  %v288_v32 = vmul.f32 %v1287_v0, %v223_v19  ;;  %v907_v36 = vand.u32 2147483647, %v286_v27 }
  0x5f   : > { %v475_v33 = vmin.f32 %v411_v24, 127.0  ;;  %v897_v28 = vor.u32 %v896_v6, %v895_v25  ;;  %v903_v34 = vand.u32 2147483647, %v902_v26  ;;  %v909_v12 = vcvt.f32.s32 %v286_v27  ;;  %v227_v24 = vld [vmem:[%s1285_s19 + $0x110] sm:$0xff] }
  0x60   : > { %v912_v35 = vand.u32 2147483648, %v286_v27  ;;  %v917_v37 = vcvt.f32.s32 %v287_v31  ;;  %v1559_v38 = vmul.f32 %v1287_v0, %v224_v11  ;;  %v915_v42 = vand.u32 2147483647, %v287_v31 }
  0x61   : > { %v526_v39 = vpack.c.bf16 %v475_v33, %v474_v29  ;;  %v898_v40 = vsel %vm1541_vm10, %v897_v28, %v284_v58  ;;  %v905_v41 = vor.u32 %v904_v23, %v903_v34  ;;  %vm1563_vm12 = vcmp.lt.f32.partialorder %v907_v36, 8388608.0  ;;  %v228_v29 = vld [vmem:[%s1285_s19 + $0x118] sm:$0xff]  ;;  %v229_v34 = vld [vmem:[%s1285_s19 + $0x120] sm:$0xff] }
  0x62   : > { %v412_v43 = vmax.f32 %v898_v40, -128.0  ;;  %v910_v47 = vcvt.s32.f32 %v909_v12  ;;  %v918_v48 = vcvt.s32.f32 %v917_v37  ;;  %v920_v49 = vand.u32 2147483648, %v287_v31 }
  0x63   : > { %558 = vst [vmem:[%s1351_s23 + $0x60] sm:$0xff] %v526_v39  ;;  %v906_v45 = vsel %vm1552_vm11, %v905_v41, %v285_v61  ;;  %v923_v50 = vand.u32 2147483647, %v288_v32  ;;  %v925_v51 = vcvt.f32.s32 %v288_v32  ;;  %vm1571_vm13 = vcmp.lt.f32.partialorder %v915_v42, 8388608.0 }
  0x64   : > { %v413_v53 = vmax.f32 %v906_v45, -128.0  ;;  %v476_v54 = vmin.f32 %v412_v43, 127.0  ;;  %v911_v55 = vand.u32 2147483647, %v910_v47  ;;  %v919_v56 = vand.u32 2147483647, %v918_v48 }
  0x65   : > { %v926_v58 = vcvt.s32.f32 %v925_v51  ;;  %v928_v59 = vand.u32 2147483648, %v288_v32  ;;  %v931_v46 = vand.u32 2147483647, %v1559_v38  ;;  %v933_v63 = vcvt.f32.s32 %v1559_v38 }
  0x66   : > { %v477_v60 = vmin.f32 %v413_v53, 127.0  ;;  %v913_v62 = vor.u32 %v912_v35, %v911_v55  ;;  %v921_v61 = vor.u32 %v920_v49, %v919_v56  ;;  %vm1578_vm14 = vcmp.lt.f32.partialorder %v923_v50, 8388608.0  ;;  %v230_v50 = vld [vmem:[%s1285_s19 + $0x128] sm:$0xff] }
  0x67   : > { %v927_v4 = vand.u32 2147483647, %v926_v58  ;;  %v936_v3 = vand.u32 2147483648, %v1559_v38  ;;  %v290_v5 = vmul.f32 %v1287_v0, %v225_v52  ;;  %v934_v9 = vcvt.s32.f32 %v933_v63 }
  0x68   : > { %v527_v6 = vpack.c.bf16 %v477_v60, %v476_v54  ;;  %v914_v7 = vsel %vm1563_vm12, %v913_v62, %v286_v27  ;;  %v922_v8 = vsel %vm1571_vm13, %v921_v61, %v287_v31  ;;  %v291_v15 = vmul.f32 %v1287_v0, %v226_v1  ;;  %v236_v1 = vld [vmem:[%s1285_s19 + $0x158] sm:$0xff] }
  0x69   : > { %v414_v10 = vmax.f32 %v914_v7, -128.0  ;;  %v415_v13 = vmax.f32 %v922_v8, -128.0  ;;  %v929_v14 = vor.u32 %v928_v59, %v927_v4  ;;  %vm1590_vm15 = vcmp.lt.f32.partialorder %v931_v46, 8388608.0  ;;  %v231_v4 = vld [vmem:[%s1285_s19 + $0x130] sm:$0xff] }
  0x6a   : > { %559 = vst [vmem:[%s1351_s23 + $0x68] sm:$0xff] %v527_v6  ;;  %v935_v17 = vand.u32 2147483647, %v934_v9  ;;  %v939_v18 = vand.u32 2147483647, %v290_v5  ;;  %v941_v19 = vcvt.f32.s32 %v290_v5  ;;  %v944_v11 = vand.u32 2147483648, %v290_v5 }
  0x6b   : > { %v478_v20 = vmin.f32 %v414_v10, 127.0  ;;  %v479_v21 = vmin.f32 %v415_v13, 127.0  ;;  %v930_v22 = vsel %vm1578_vm14, %v929_v14, %v288_v32  ;;  %v947_v23 = vand.u32 2147483647, %v291_v15  ;;  %v232_v14 = vld [vmem:[%s1285_s19 + $0x138] sm:$0xff] }
  0x6c   : > { %v937_v25 = vor.u32 %v936_v3, %v935_v17  ;;  %v416_v26 = vmax.f32 %v930_v22, -128.0  ;;  %v942_v27 = vcvt.s32.f32 %v941_v19  ;;  %vm1598_vm0 = vcmp.lt.f32.partialorder %v939_v18, 8388608.0 }
  0x6d   : > { %v528_v30 = vpack.c.bf16 %v479_v21, %v478_v20  ;;  %vm1602_vm1 = vcmp.lt.f32.partialorder %v947_v23, 8388608.0  ;;  %v949_v28 = vcvt.f32.s32 %v291_v15  ;;  %v952_v12 = vand.u32 2147483648, %v291_v15 }
  0x6e   : > { %v938_v32 = vsel %vm1590_vm15, %v937_v25, %v1559_v38  ;;  %v943_v36 = vand.u32 2147483647, %v942_v27  ;;  %v292_v35 = vmul.f32 %v1287_v0, %v227_v24  ;;  %v480_v39 = vmin.f32 %v416_v26, 127.0 }
  0x6f   : > { %560 = vst [vmem:[%s1351_s23 + $0x70] sm:$0xff] %v528_v30  ;;  %v417_v37 = vmax.f32 %v938_v32, -128.0  ;;  %v950_v40 = vcvt.s32.f32 %v949_v28  ;;  %v293_v41 = vmul.f32 %v1287_v0, %v228_v29  ;;  %v294_v47 = vmul.f32 %v1287_v0, %v229_v34  ;;  %v233_v32 = vld [vmem:[%s1285_s19 + $0x140] sm:$0xff] }
  0x70   : > { %v945_v42 = vor.u32 %v944_v11, %v943_v36  ;;  %v955_v43 = vand.u32 2147483647, %v292_v35  ;;  %v957_v44 = vcvt.f32.s32 %v292_v35  ;;  %v960_v54 = vand.u32 2147483648, %v292_v35 }
  0x71   : > { %v481_v48 = vmin.f32 %v417_v37, 127.0  ;;  %v951_v45 = vand.u32 2147483647, %v950_v40  ;;  %v963_v38 = vand.u32 2147483647, %v293_v41  ;;  %v965_v49 = vcvt.f32.s32 %v293_v41 }
  0x72   : > { %v946_v51 = vsel %vm1598_vm0, %v945_v42, %v290_v5  ;;  %vm1617_vm2 = vcmp.lt.f32.partialorder %v955_v43, 8388608.0  ;;  %v958_v53 = vcvt.s32.f32 %v957_v44  ;;  %v968_v58 = vand.u32 2147483648, %v293_v41 }
  0x73   : > { %v529_v55 = vpack.c.bf16 %v481_v48, %v480_v39  ;;  %v953_v56 = vor.u32 %v952_v12, %v951_v45  ;;  %v418_v57 = vmax.f32 %v946_v51, -128.0  ;;  %v966_v46 = vcvt.s32.f32 %v965_v49  ;;  %v234_v39 = vld [vmem:[%s1285_s19 + $0x148] sm:$0xff] }
  0x74   : > { %v959_v59 = vand.u32 2147483647, %v958_v53  ;;  %v295_v60 = vmul.f32 %v1287_v0, %v230_v50  ;;  %v971_v62 = vand.u32 2147483647, %v294_v47  ;;  %vm1625_vm3 = vcmp.lt.f32.partialorder %v963_v38, 8388608.0 }
  0x75   : > { %561 = vst [vmem:[%s1351_s23 + $0x78] sm:$0xff] %v529_v55  ;;  %v954_v61 = vsel %vm1602_vm1, %v953_v56, %v291_v15  ;;  %v482_v63 = vmin.f32 %v418_v57, 127.0  ;;  %v973_v2 = vcvt.f32.s32 %v294_v47  ;;  %v967_v6 = vand.u32 2147483647, %v966_v46  ;;  %v235_v46 = vld [vmem:[%s1285_s19 + $0x150] sm:$0xff] }
  0x76   : > { %v419_v3 = vmax.f32 %v954_v61, -128.0  ;;  %v961_v5 = vor.u32 %v960_v54, %v959_v59  ;;  %v976_v7 = vand.u32 2147483648, %v294_v47  ;;  %vm1630_vm4 = vcmp.lt.f32.partialorder %v971_v62, 8388608.0 }
  0x77   : > { %v974_v9 = vcvt.s32.f32 %v973_v2  ;;  %v979_v10 = vand.u32 2147483647, %v295_v60  ;;  %v981_v13 = vcvt.f32.s32 %v295_v60  ;;  %v969_v17 = vor.u32 %v968_v58, %v967_v6 }
  0x78   : > { %v483_v15 = vmin.f32 %v419_v3, 127.0  ;;  %v962_v16 = vsel %vm1617_vm2, %v961_v5, %v292_v35  ;;  %v296_v18 = vmul.f32 %v1287_v0, %v231_v4  ;;  %v984_v22 = vand.u32 2147483648, %v295_v60 }
  0x79   : > { %v420_v19 = vmax.f32 %v962_v16, -128.0  ;;  %v975_v20 = vand.u32 2147483647, %v974_v9  ;;  %v982_v21 = vcvt.s32.f32 %v981_v13  ;;  %v970_v24 = vsel %vm1625_vm3, %v969_v17, %v293_v41 }
  0x7a   : > { %v530_v23 = vpack.c.bf16 %v483_v15, %v482_v63  ;;  %v297_v25 = vmul.f32 %v1287_v0, %v232_v14  ;;  %v987_v26 = vand.u32 2147483647, %v296_v18  ;;  %v421_v27 = vmax.f32 %v970_v24, -128.0  ;;  %v242_v14 = vld [vmem:[%s1285_s19 + $0x188] sm:$0xff] }
  0x7b   : > { %v484_v11 = vmin.f32 %v420_v19, 127.0  ;;  %v977_v29 = vor.u32 %v976_v7, %v975_v20  ;;  %v983_v30 = vand.u32 2147483647, %v982_v21  ;;  %vm1642_vm5 = vcmp.lt.f32.partialorder %v979_v10, 8388608.0  ;;  %v237_v10 = vld [vmem:[%s1285_s19 + $0x160] sm:$0xff] }
  0x7c   : > { %562 = vst [vmem:[%s1351_s23 + $0x80] sm:$0xff] %v530_v23  ;;  %vm1646_vm6 = vcmp.lt.f32.partialorder %v987_v26, 8388608.0  ;;  %v989_v28 = vcvt.f32.s32 %v296_v18  ;;  %v995_v34 = vand.u32 2147483647, %v297_v25  ;;  %v485_v36 = vmin.f32 %v421_v27, 127.0 }
  0x7d   : > { %v978_v12 = vsel %vm1630_vm4, %v977_v29, %v294_v47  ;;  %v985_v35 = vor.u32 %v984_v22, %v983_v30  ;;  %v997_v37 = vcvt.f32.s32 %v297_v25  ;;  %v992_v42 = vand.u32 2147483648, %v296_v18  ;;  %v238_v29 = vld [vmem:[%s1285_s19 + $0x168] sm:$0xff] }
  0x7e   : > { %v422_v40 = vmax.f32 %v978_v12, -128.0  ;;  %v990_v41 = vcvt.s32.f32 %v989_v28  ;;  %v1000_v43 = vand.u32 2147483648, %v297_v25  ;;  %v531_v44 = vpack.c.bf16 %v485_v36, %v484_v11 }
  0x7f   : > { %v986_v48 = vsel %vm1642_vm5, %v985_v35, %v295_v60  ;;  %v998_v45 = vcvt.s32.f32 %v997_v37  ;;  %v298_v38 = vmul.f32 %v1287_v0, %v233_v32  ;;  %v299_v47 = vmul.f32 %v1287_v0, %v234_v39 }
  0x80   : > { %v423_v49 = vmax.f32 %v986_v48, -128.0  ;;  %v486_v50 = vmin.f32 %v422_v40, 127.0  ;;  %v991_v51 = vand.u32 2147483647, %v990_v41  ;;  %563 = vst [vmem:[%s1351_s23 + $0x88] sm:$0xff] %v531_v44  ;;  %vm1659_vm7 = vcmp.lt.f32.partialorder %v995_v34, 8388608.0 }
  0x81   : > { %v999_v53 = vand.u32 2147483647, %v998_v45  ;;  %v1003_v54 = vand.u32 2147483647, %v298_v38  ;;  %v1005_v55 = vcvt.f32.s32 %v298_v38  ;;  %v1011_v58 = vand.u32 2147483647, %v299_v47 }
  0x82   : > { %v487_v56 = vmin.f32 %v423_v49, 127.0  ;;  %v993_v57 = vor.u32 %v992_v42, %v991_v51  ;;  %v1013_v59 = vcvt.f32.s32 %v299_v47  ;;  %v1008_v63 = vand.u32 2147483648, %v298_v38  ;;  %v240_v51 = vld [vmem:[%s1285_s19 + $0x178] sm:$0xff] }
  0x83   : > { %v1001_v60 = vor.u32 %v1000_v43, %v999_v53  ;;  %vm1664_vm8 = vcmp.lt.f32.partialorder %v1003_v54, 8388608.0  ;;  %v1006_v61 = vcvt.s32.f32 %v1005_v55  ;;  %v1016_v5 = vand.u32 2147483648, %v299_v47 }
  0x84   : > { %v532_v2 = vpack.c.bf16 %v487_v56, %v486_v50  ;;  %v994_v4 = vsel %vm1646_vm6, %v993_v57, %v296_v18  ;;  %v1014_v3 = vcvt.s32.f32 %v1013_v59  ;;  %v300_v9 = vmul.f32 %v1287_v0, %v235_v46  ;;  %v239_v50 = vld [vmem:[%s1285_s19 + $0x170] sm:$0xff]  ;;  %v241_v59 = vld [vmem:[%s1285_s19 + $0x180] sm:$0xff] }
  0x85   : > { %v1002_v6 = vsel %vm1659_vm7, %v1001_v60, %v297_v25  ;;  %v424_v7 = vmax.f32 %v994_v4, -128.0  ;;  %v1007_v8 = vand.u32 2147483647, %v1006_v61  ;;  %vm1676_vm9 = vcmp.lt.f32.partialorder %v1011_v58, 8388608.0 }
  0x86   : > { %564 = vst [vmem:[%s1351_s23 + $0x90] sm:$0xff] %v532_v2  ;;  %v425_v13 = vmax.f32 %v1002_v6, -128.0  ;;  %v1015_v15 = vand.u32 2147483647, %v1014_v3  ;;  %v301_v16 = vmul.f32 %v1287_v0, %v236_v1  ;;  %v1019_v19 = vand.u32 2147483647, %v300_v9 }
  0x87   : > { %v488_v17 = vmin.f32 %v424_v7, 127.0  ;;  %v1009_v18 = vor.u32 %v1008_v63, %v1007_v8  ;;  %v1021_v20 = vcvt.f32.s32 %v300_v9  ;;  %v1024_v23 = vand.u32 2147483648, %v300_v9 }
  0x88   : > { %v489_v21 = vmin.f32 %v425_v13, 127.0  ;;  %v1017_v22 = vor.u32 %v1016_v5, %v1015_v15  ;;  %v302_v24 = vmul.f32 %v1287_v0, %v237_v10  ;;  %v1027_v27 = vand.u32 2147483647, %v301_v16 }
  0x89   : > { %v1010_v25 = vsel %vm1664_vm8, %v1009_v18, %v298_v38  ;;  %v1022_v26 = vcvt.s32.f32 %v1021_v20  ;;  %v1029_v11 = vcvt.f32.s32 %v301_v16  ;;  %vm1687_vm10 = vcmp.lt.f32.partialorder %v1019_v19, 8388608.0 }
  0x8a   : > { %v533_v30 = vpack.c.bf16 %v489_v21, %v488_v17  ;;  %v1018_v31 = vsel %vm1676_vm9, %v1017_v22, %v299_v47  ;;  %v426_v33 = vmax.f32 %v1010_v25, -128.0  ;;  %v1032_v12 = vand.u32 2147483648, %v301_v16 }
  0x8b   : > { %v427_v34 = vmax.f32 %v1018_v31, -128.0  ;;  %v1023_v32 = vand.u32 2147483647, %v1022_v26  ;;  %v1030_v36 = vcvt.s32.f32 %v1029_v11  ;;  %v303_v37 = vmul.f32 %v1287_v0, %v238_v29 }
  0x8c   : > { %565 = vst [vmem:[%s1351_s23 + $0x98] sm:$0xff] %v533_v30  ;;  %v490_v35 = vmin.f32 %v426_v33, 127.0  ;;  %v1035_v39 = vand.u32 2147483647, %v302_v24  ;;  %v1037_v40 = vcvt.f32.s32 %v302_v24  ;;  %vm1693_vm11 = vcmp.lt.f32.partialorder %v1027_v27, 8388608.0 }
  0x8d   : > { %v491_v41 = vmin.f32 %v427_v34, 127.0  ;;  %v1025_v42 = vor.u32 %v1024_v23, %v1023_v32  ;;  %v1031_v44 = vand.u32 2147483647, %v1030_v36  ;;  %v1040_v45 = vand.u32 2147483648, %v302_v24  ;;  %v243_v32 = vld [vmem:[%s1285_s19 + $0x190] sm:$0xff] }
  0x8e   : > { %v1038_v48 = vcvt.s32.f32 %v1037_v40  ;;  %v1043_v38 = vand.u32 2147483647, %v303_v37  ;;  %v1045_v49 = vcvt.f32.s32 %v303_v37  ;;  %vm1701_vm12 = vcmp.lt.f32.partialorder %v1035_v39, 8388608.0  ;;  %v244_v39 = vld [vmem:[%s1285_s19 + $0x198] sm:$0xff] }
  0x8f   : > { %v534_v47 = vpack.c.bf16 %v491_v41, %v490_v35  ;;  %v1026_v52 = vsel %vm1687_vm10, %v1025_v42, %v300_v9  ;;  %v1033_v53 = vor.u32 %v1032_v12, %v1031_v44  ;;  %v1048_v58 = vand.u32 2147483648, %v303_v37 }
  0x90   : > { %v428_v55 = vmax.f32 %v1026_v52, -128.0  ;;  %v1039_v56 = vand.u32 2147483647, %v1038_v48  ;;  %v1046_v57 = vcvt.s32.f32 %v1045_v49  ;;  %vm1709_vm13 = vcmp.lt.f32.partialorder %v1043_v38, 8388608.0  ;;  %v245_v49 = vld [vmem:[%s1285_s19 + $0x1a0] sm:$0xff] }
  0x91   : > { %566 = vst [vmem:[%s1351_s23 + $0xa0] sm:$0xff] %v534_v47  ;;  %v1034_v46 = vsel %vm1693_vm11, %v1033_v53, %v301_v16  ;;  %v304_v62 = vmul.f32 %v1287_v0, %v239_v50  ;;  %v305_v61 = vmul.f32 %v1287_v0, %v240_v51  ;;  %v1716_v7 = vmul.f32 %v1287_v0, %v241_v59  ;;  %v250_v51 = vld [vmem:[%s1285_s19 + $0x1c8] sm:$0xff] }
  0x92   : > { %v429_v63 = vmax.f32 %v1034_v46, -128.0  ;;  %v492_v1 = vmin.f32 %v428_v55, 127.0  ;;  %v1041_v2 = vor.u32 %v1040_v45, %v1039_v56  ;;  %v1047_v4 = vand.u32 2147483647, %v1046_v57 }
  0x93   : > { %v1051_v3 = vand.u32 2147483647, %v304_v62  ;;  %v1053_v5 = vcvt.f32.s32 %v304_v62  ;;  %v1059_v6 = vand.u32 2147483647, %v305_v61  ;;  %v1061_v13 = vcvt.f32.s32 %v305_v61 }
  0x94   : > { %v493_v8 = vmin.f32 %v429_v63, 127.0  ;;  %v1042_v9 = vsel %vm1701_vm12, %v1041_v2, %v302_v24  ;;  %v1049_v10 = vor.u32 %v1048_v58, %v1047_v4  ;;  %v1056_v18 = vand.u32 2147483648, %v304_v62 }
  0x95   : > { %v430_v15 = vmax.f32 %v1042_v9, -128.0  ;;  %vm1721_vm14 = vcmp.lt.f32.partialorder %v1051_v3, 8388608.0  ;;  %v1054_v17 = vcvt.s32.f32 %v1053_v5  ;;  %v1062_v21 = vcvt.s32.f32 %v1061_v13 }
  0x96   : > { %v535_v19 = vpack.c.bf16 %v493_v8, %v492_v1  ;;  %v1050_v20 = vsel %vm1709_vm13, %v1049_v10, %v303_v37  ;;  %v1064_v22 = vand.u32 2147483648, %v305_v61  ;;  %v307_v26 = vmul.f32 %v1287_v0, %v242_v14  ;;  %v246_v1 = vld [vmem:[%s1285_s19 + $0x1a8] sm:$0xff] }
  0x97   : > { %v431_v23 = vmax.f32 %v1050_v20, -128.0  ;;  %v494_v24 = vmin.f32 %v430_v15, 127.0  ;;  %v1055_v25 = vand.u32 2147483647, %v1054_v17  ;;  %vm1729_vm15 = vcmp.lt.f32.partialorder %v1059_v6, 8388608.0 }
  0x98   : > { %567 = vst [vmem:[%s1351_s23 + $0xa8] sm:$0xff] %v535_v19  ;;  %v1063_v11 = vand.u32 2147483647, %v1062_v21  ;;  %v1067_v29 = vand.u32 2147483647, %v1716_v7  ;;  %v1069_v30 = vcvt.f32.s32 %v1716_v7  ;;  %v1077_v34 = vcvt.f32.s32 %v307_v26 }
  0x99   : > { %v495_v31 = vmin.f32 %v431_v23, 127.0  ;;  %v1057_v33 = vor.u32 %v1056_v18, %v1055_v25  ;;  %v1075_v28 = vand.u32 2147483647, %v307_v26  ;;  %v1072_v37 = vand.u32 2147483648, %v1716_v7  ;;  %v248_v25 = vld [vmem:[%s1285_s19 + $0x1b8] sm:$0xff] }
  0x9a   : > { %v1065_v36 = vor.u32 %v1064_v22, %v1063_v11  ;;  %vm1736_vm0 = vcmp.lt.f32.partialorder %v1067_v29, 8388608.0  ;;  %v1070_v35 = vcvt.s32.f32 %v1069_v30  ;;  %v1078_v42 = vcvt.s32.f32 %v1077_v34  ;;  %v249_v34 = vld [vmem:[%s1285_s19 + $0x1c0] sm:$0xff] }
  0x9b   : > { %v536_v40 = vpack.c.bf16 %v495_v31, %v494_v24  ;;  %v1058_v41 = vsel %vm1721_vm14, %v1057_v33, %v304_v62  ;;  %v1080_v43 = vand.u32 2147483648, %v307_v26  ;;  %v308_v38 = vmul.f32 %v1287_v0, %v243_v32  ;;  %v247_v24 = vld [vmem:[%s1285_s19 + $0x1b0] sm:$0xff] }
  0x9c   : > { %v1066_v44 = vsel %vm1729_vm15, %v1065_v36, %v305_v61  ;;  %v432_v48 = vmax.f32 %v1058_v41, -128.0  ;;  %v1071_v45 = vand.u32 2147483647, %v1070_v35  ;;  %vm1749_vm1 = vcmp.lt.f32.partialorder %v1075_v28, 8388608.0 }
  0x9d   : > { %568 = vst [vmem:[%s1351_s23 + $0xb0] sm:$0xff] %v536_v40  ;;  %v433_v50 = vmax.f32 %v1066_v44, -128.0  ;;  %v1079_v47 = vand.u32 2147483647, %v1078_v42  ;;  %v309_v52 = vmul.f32 %v1287_v0, %v244_v39  ;;  %v1083_v55 = vand.u32 2147483647, %v308_v38 }
  0x9e   : > { %v496_v53 = vmin.f32 %v432_v48, 127.0  ;;  %v1073_v54 = vor.u32 %v1072_v37, %v1071_v45  ;;  %v1085_v56 = vcvt.f32.s32 %v308_v38  ;;  %v1088_v59 = vand.u32 2147483648, %v308_v38 }
  0x9f   : > { %v497_v57 = vmin.f32 %v433_v50, 127.0  ;;  %v1081_v58 = vor.u32 %v1080_v43, %v1079_v47  ;;  %v310_v46 = vmul.f32 %v1287_v0, %v245_v49  ;;  %v1091_v61 = vand.u32 2147483647, %v309_v52 }
  0xa0   : > { %v1074_v60 = vsel %vm1736_vm0, %v1073_v54, %v1716_v7  ;;  %v1086_v62 = vcvt.s32.f32 %v1085_v56  ;;  %v1093_v63 = vcvt.f32.s32 %v309_v52  ;;  %vm1761_vm2 = vcmp.lt.f32.partialorder %v1083_v55, 8388608.0 }
  0xa1   : > { %v537_v2 = vpack.c.bf16 %v497_v57, %v496_v53  ;;  %v1082_v4 = vsel %vm1749_vm1, %v1081_v58, %v307_v26  ;;  %v434_v3 = vmax.f32 %v1074_v60, -128.0  ;;  %v1096_v10 = vand.u32 2147483648, %v309_v52 }
  0xa2   : > { %v435_v6 = vmax.f32 %v1082_v4, -128.0  ;;  %v1087_v8 = vand.u32 2147483647, %v1086_v62  ;;  %v1094_v9 = vcvt.s32.f32 %v1093_v63  ;;  %v311_v13 = vmul.f32 %v1287_v0, %v246_v1 }
  0xa3   : > { %569 = vst [vmem:[%s1351_s23 + $0xb8] sm:$0xff] %v537_v2  ;;  %v498_v7 = vmin.f32 %v434_v3, 127.0  ;;  %v1099_v14 = vand.u32 2147483647, %v310_v46  ;;  %v1101_v15 = vcvt.f32.s32 %v310_v46  ;;  %vm1767_vm3 = vcmp.lt.f32.partialorder %v1091_v61, 8388608.0 }
  0xa4   : > { %v499_v16 = vmin.f32 %v435_v6, 127.0  ;;  %v1089_v17 = vor.u32 %v1088_v59, %v1087_v8  ;;  %v1095_v19 = vand.u32 2147483647, %v1094_v9  ;;  %v1104_v21 = vand.u32 2147483648, %v310_v46  ;;  %v251_v6 = vld [vmem:[%s1285_s19 + $0x1d0] sm:$0xff] }
  0xa5   : > { %v1102_v20 = vcvt.s32.f32 %v1101_v15  ;;  %v1107_v22 = vand.u32 2147483647, %v311_v13  ;;  %v1109_v23 = vcvt.f32.s32 %v311_v13  ;;  %vm1775_vm4 = vcmp.lt.f32.partialorder %v1099_v14, 8388608.0 }
  0xa6   : > { %v538_v26 = vpack.c.bf16 %v499_v16, %v498_v7  ;;  %v1090_v27 = vsel %vm1761_vm2, %v1089_v17, %v308_v38  ;;  %v1097_v11 = vor.u32 %v1096_v10, %v1095_v19  ;;  %v1112_v28 = vand.u32 2147483648, %v311_v13 }
  0xa7   : > { %v436_v30 = vmax.f32 %v1090_v27, -128.0  ;;  %v1103_v31 = vand.u32 2147483647, %v1102_v20  ;;  %v1110_v33 = vcvt.s32.f32 %v1109_v23  ;;  %vm1783_vm5 = vcmp.lt.f32.partialorder %v1107_v22, 8388608.0  ;;  %v253_v22 = vld [vmem:[%s1285_s19 + $0x1e0] sm:$0xff] }
  0xa8   : > { %570 = vst [vmem:[%s1351_s23 + $0xc0] sm:$0xff] %v538_v26  ;;  %v1098_v32 = vsel %vm1767_vm3, %v1097_v11, %v309_v52  ;;  %v312_v12 = vmul.f32 %v1287_v0, %v247_v24  ;;  %v313_v35 = vmul.f32 %v1287_v0, %v248_v25  ;;  %v314_v48 = vmul.f32 %v1287_v0, %v249_v34 }
  0xa9   : > { %v437_v37 = vmax.f32 %v1098_v32, -128.0  ;;  %v500_v39 = vmin.f32 %v436_v30, 127.0  ;;  %v1105_v40 = vor.u32 %v1104_v21, %v1103_v31  ;;  %v1111_v41 = vand.u32 2147483647, %v1110_v33 }
  0xaa   : > { %v1115_v42 = vand.u32 2147483647, %v312_v12  ;;  %v1117_v43 = vcvt.f32.s32 %v312_v12  ;;  %v1123_v44 = vand.u32 2147483647, %v313_v35  ;;  %v1125_v50 = vcvt.f32.s32 %v313_v35 }
  0xab   : > { %v501_v45 = vmin.f32 %v437_v37, 127.0  ;;  %v1106_v38 = vsel %vm1775_vm4, %v1105_v40, %v310_v46  ;;  %v1113_v49 = vor.u32 %v1112_v28, %v1111_v41  ;;  %v1120_v53 = vand.u32 2147483648, %v312_v12 }
  0xac   : > { %v438_v47 = vmax.f32 %v1106_v38, -128.0  ;;  %v1118_v52 = vcvt.s32.f32 %v1117_v43  ;;  %v1126_v56 = vcvt.s32.f32 %v1125_v50  ;;  %v1128_v57 = vand.u32 2147483648, %v313_v35 }
  0xad   : > { %v539_v54 = vpack.c.bf16 %v501_v45, %v500_v39  ;;  %v1114_v55 = vsel %vm1783_vm5, %v1113_v49, %v311_v13  ;;  %v315_v62 = vmul.f32 %v1287_v0, %v250_v51  ;;  %vm1797_vm6 = vcmp.lt.f32.partialorder %v1115_v42, 8388608.0  ;;  %v252_v13 = vld [vmem:[%s1285_s19 + $0x1d8] sm:$0xff] }
  0xae   : > { %v439_v58 = vmax.f32 %v1114_v55, -128.0  ;;  %v502_v59 = vmin.f32 %v438_v47, 127.0  ;;  %v1119_v60 = vand.u32 2147483647, %v1118_v52  ;;  %vm1801_vm7 = vcmp.lt.f32.partialorder %v1123_v44, 8388608.0 }
  0xaf   : > { %571 = vst [vmem:[%s1351_s23 + $0xc8] sm:$0xff] %v539_v54  ;;  %v1127_v63 = vand.u32 2147483647, %v1126_v56  ;;  %v1133_v1 = vcvt.f32.s32 %v314_v48  ;;  %v1131_v3 = vand.u32 2147483647, %v314_v48  ;;  %v1141_v5 = vcvt.f32.s32 %v315_v62 }
  0xb0   : > { %v503_v2 = vmin.f32 %v439_v58, 127.0  ;;  %v1121_v4 = vor.u32 %v1120_v53, %v1119_v60  ;;  %v1136_v10 = vand.u32 2147483648, %v314_v48  ;;  %v1139_v7 = vand.u32 2147483647, %v315_v62  ;;  %v255_v58 = vld [vmem:[%s1285_s19 + $0x1f0] sm:$0xff] }
  0xb1   : > { %v1129_v8 = vor.u32 %v1128_v57, %v1127_v63  ;;  %v1134_v9 = vcvt.s32.f32 %v1133_v1  ;;  %v1142_v16 = vcvt.s32.f32 %v1141_v5  ;;  %v1144_v17 = vand.u32 2147483648, %v315_v62 }
  0xb2   : > { %v540_v14 = vpack.c.bf16 %v503_v2, %v502_v59  ;;  %v1122_v15 = vsel %vm1797_vm6, %v1121_v4, %v312_v12  ;;  %v316_v21 = vmul.f32 %v1287_v0, %v251_v6  ;;  %vm1814_vm8 = vcmp.lt.f32.partialorder %v1131_v3, 8388608.0  ;;  %v256_v59 = vld [vmem:[%s1285_s19 + $0x1f8] sm:$0xff] }
  0xb3   : > { %v1130_v18 = vsel %vm1801_vm7, %v1129_v8, %v313_v35  ;;  %v440_v19 = vmax.f32 %v1122_v15, -128.0  ;;  %v1135_v20 = vand.u32 2147483647, %v1134_v9  ;;  %v1143_v25 = vand.u32 2147483647, %v1142_v16  ;;  %v254_v35 = vld [vmem:[%s1285_s19 + $0x1e8] sm:$0xff] }
  0xb4   : > { %572 = vst [vmem:[%s1351_s23 + $0xd0] sm:$0xff] %v540_v14  ;;  %v441_v23 = vmax.f32 %v1130_v18, -128.0  ;;  %v317_v26 = vmul.f32 %v1287_v0, %v252_v13  ;;  %vm1140_vm9 = vcmp.lt.f32.partialorder %v1139_v7, 8388608.0  ;;  %v1149_v29 = vcvt.f32.s32 %v316_v21 }
  0xb5   : > { %v504_v27 = vmin.f32 %v440_v19, 127.0  ;;  %v1137_v11 = vor.u32 %v1136_v10, %v1135_v20  ;;  %v1145_v31 = vor.u32 %v1144_v17, %v1143_v25  ;;  %v1147_v33 = vand.u32 2147483647, %v316_v21 }
  0xb6   : > { %v505_v30 = vmin.f32 %v441_v23, 127.0  ;;  %v318_v28 = vmul.f32 %v1287_v0, %v253_v22  ;;  %v1150_v32 = vcvt.s32.f32 %v1149_v29  ;;  %v1152_v36 = vand.u32 2147483648, %v316_v21 }
  0xb7   : > { %v1138_v34 = vsel %vm1814_vm8, %v1137_v11, %v314_v48  ;;  %v1157_v12 = vcvt.f32.s32 %v317_v26  ;;  %v1146_v39 = vsel %vm1140_vm9, %v1145_v31, %v315_v62  ;;  %v1155_v41 = vand.u32 2147483647, %v317_v26 }
  0xb8   : > { %v541_v37 = vpack.c.bf16 %v505_v30, %v504_v27  ;;  %v442_v40 = vmax.f32 %v1138_v34, -128.0  ;;  %v443_v42 = vmax.f32 %v1146_v39, -128.0  ;;  %v1151_v43 = vand.u32 2147483647, %v1150_v32 }
  0xb9   : > { %v1158_v44 = vcvt.s32.f32 %v1157_v12  ;;  %v1160_v45 = vand.u32 2147483648, %v317_v26  ;;  %vm1824_vm10 = vcmp.lt.f32.partialorder %v1147_v33, 8388608.0  ;;  %v319_v48 = vmul.f32 %v1287_v0, %v254_v35 }
  0xba   : > { %573 = vst [vmem:[%s1351_s23 + $0xd8] sm:$0xff] %v541_v37  ;;  %v506_v38 = vmin.f32 %v442_v40, 127.0  ;;  %v1165_v50 = vcvt.f32.s32 %v318_v28  ;;  %v507_v51 = vmin.f32 %v443_v42, 127.0  ;;  %v1153_v47 = vor.u32 %v1152_v36, %v1151_v43 }
  0xbb   : > { %v1159_v52 = vand.u32 2147483647, %v1158_v44  ;;  %v1163_v53 = vand.u32 2147483647, %v318_v28  ;;  %vm1829_vm11 = vcmp.lt.f32.partialorder %v1155_v41, 8388608.0  ;;  %v1168_v56 = vand.u32 2147483648, %v318_v28 }
  0xbc   : > { %v1166_v55 = vcvt.s32.f32 %v1165_v50  ;;  %v1173_v57 = vcvt.f32.s32 %v319_v48  ;;  %v542_v60 = vpack.c.bf16 %v507_v51, %v506_v38  ;;  %v1154_v62 = vsel %vm1824_vm10, %v1153_v47, %v316_v21 }
  0xbd   : > { %v1161_v46 = vor.u32 %v1160_v45, %v1159_v52  ;;  %v1171_v61 = vand.u32 2147483647, %v319_v48  ;;  %v444_v63 = vmax.f32 %v1154_v62, -128.0  ;;  %v1176_v4 = vand.u32 2147483648, %v319_v48 }
  0xbe   : > { %v1167_v1 = vand.u32 2147483647, %v1166_v55  ;;  %v1174_v2 = vcvt.s32.f32 %v1173_v57  ;;  %574 = vst [vmem:[%s1351_s23 + $0xe0] sm:$0xff] %v542_v60  ;;  %vm1164_vm12 = vcmp.lt.f32.partialorder %v1163_v53, 8388608.0  ;;  %v320_v5 = vmul.f32 %v1287_v0, %v255_v58 }
  0xbf   : > { %v1162_v3 = vsel %vm1829_vm11, %v1161_v46, %v317_v26  ;;  %v321_v6 = vmul.f32 %v1287_v0, %v256_v59  ;;  %v508_v9 = vmin.f32 %v444_v63, 127.0  ;;  %vm1172_vm13 = vcmp.lt.f32.partialorder %v1171_v61, 8388608.0 }
  0xc0   : > { %v445_v8 = vmax.f32 %v1162_v3, -128.0  ;;  %v1169_v10 = vor.u32 %v1168_v56, %v1167_v1  ;;  %v1175_v7 = vand.u32 2147483647, %v1174_v2  ;;  %v1179_v13 = vand.u32 2147483647, %v320_v5 }
  0xc1   : > { %v1181_v14 = vcvt.f32.s32 %v320_v5  ;;  %v1189_v18 = vcvt.f32.s32 %v321_v6  ;;  %v1184_v21 = vand.u32 2147483648, %v320_v5  ;;  %v1187_v22 = vand.u32 2147483647, %v321_v6 }
  0xc2   : > { %v509_v15 = vmin.f32 %v445_v8, 127.0  ;;  %v1170_v16 = vsel %vm1164_vm12, %v1169_v10, %v318_v28  ;;  %v1177_v17 = vor.u32 %v1176_v4, %v1175_v7  ;;  %v1192_v0 = vand.u32 2147483648, %v321_v6 }
  0xc3   : > { %v446_v19 = vmax.f32 %v1170_v16, -128.0  ;;  %v1182_v20 = vcvt.s32.f32 %v1181_v14  ;;  %v1190_v25 = vcvt.s32.f32 %v1189_v18  ;;  %vm1180_vm14 = vcmp.lt.f32.partialorder %v1179_v13, 8388608.0 }
  0xc4   : > { %v543_v23 = vpack.c.bf16 %v509_v15, %v508_v9  ;;  %v1178_v24 = vsel %vm1172_vm13, %v1177_v17, %v319_v48  ;;  %vm1188_vm15 = vcmp.lt.f32.partialorder %v1187_v22, 8388608.0 }
  0xc5   : > { %v447_v26 = vmax.f32 %v1178_v24, -128.0  ;;  %v510_v27 = vmin.f32 %v446_v19, 127.0  ;;  %v1183_v11 = vand.u32 2147483647, %v1182_v20  ;;  %v1191_v29 = vand.u32 2147483647, %v1190_v25 }
  0xc6   : > { %575 = vst [vmem:[%s1351_s23 + $0xe8] sm:$0xff] %v543_v23 }
  0xc7   : > { %v511_v30 = vmin.f32 %v447_v26, 127.0  ;;  %v1185_v31 = vor.u32 %v1184_v21, %v1183_v11  ;;  %v1193_v33 = vor.u32 %v1192_v0, %v1191_v29 }
  0xc9   : > { %v544_v28 = vpack.c.bf16 %v511_v30, %v510_v27  ;;  %v1186_v34 = vsel %vm1180_vm14, %v1185_v31, %v320_v5  ;;  %v1194_v32 = vsel %vm1188_vm15, %v1193_v33, %v321_v6 }
  0xca   : > { %v448_v36 = vmax.f32 %v1186_v34, -128.0  ;;  %v449_v12 = vmax.f32 %v1194_v32, -128.0 }
  0xcb   : > { %576 = vst [vmem:[%s1351_s23 + $0xf0] sm:$0xff] %v544_v28 }
  0xcc   : > { %v512_v35 = vmin.f32 %v448_v36, 127.0  ;;  %v513_v37 = vmin.f32 %v449_v12, 127.0 }
  0xce   : > { %v545_v39 = vpack.c.bf16 %v513_v37, %v512_v35 }
  0xd0   : > { %577 = vst [vmem:[%s1351_s23 + $0xf8] sm:$0xff] %v545_v39 }
  0xd1 PF: > { %s13_s13 = sadd.s32 1, %s1241_s13   ;;  %s1975_s11 = smov %s1237_s12 }
  0xd2   : > { %p10_p5 = scmp.ge.s32.totalorder %s13_s13, 6   ;;  %s1976_s12 = smov %s1978_s0 }
  0xd4   :  { %12 = sbr.rel (!%p10_p5) target bundleno = 2 (0x2), region = 58 }

</bundles_post_ra>
